<compile_context>
chip_gen: v7x
topology: tpu7x:2x2x1
jax: 0.10.0
libtpu: 0.0.40
codegen_flags: <defaults>
</compile_context>

<pallas_src>
import numpy as np
import jax
import jax.numpy as jnp
from jax import lax
from jax.experimental import pallas as pl
from jax.experimental.pallas import tpu as pltpu


# ---------------------------------------------------------------------------
# Fused kernel: conv(3x3, pad=1, no bias) + GroupNorm(1, C) + ReLU + Flatten
#               + Linear/ReLU x2 + [p_delta | L] head + L @ L^T
# ---------------------------------------------------------------------------
def pose_decoder_kernel(patches_ref, wconv_ref, gamma_ref, beta_ref,
                        w1_ref, b1_ref, w2_ref, b2_ref,
                        whead_ref, bhead_ref,
                        pd_ref, psig_ref):
    Cc = wconv_ref.shape[0]              # compression channels
    F = gamma_ref.shape[1]               # Cc * H * W  (flat feature size)
    HW = F // Cc
    B = patches_ref.shape[1] // HW
    n = pd_ref.shape[1]                  # num_of_outputs

    # --- conv as one im2col matmul, transposed so the output is lane-dense ---
    # conv[c, b*HW + hw] = sum_k W[c, k] * patch[k, b*HW + hw]
    conv = jnp.dot(wconv_ref[...], patches_ref[...],
                   preferred_element_type=jnp.float32)          # (Cc, B*HW)

    # --- Flatten(1) to (B, Cc*HW) in NCHW (c, h, w) order -------------------
    # (only 128-aligned static slices + concats; no generic reshape relayout)
    flat = jnp.concatenate(
        [jnp.concatenate(
            [conv[c:c + 1, b * HW:(b + 1) * HW] for c in range(Cc)], axis=1)
         for b in range(B)], axis=0)                            # (B, F)

    # --- GroupNorm(1, C): per-sample normalization over all (C,H,W) ----------
    inv_n = 1.0 / float(F)
    mean = jnp.sum(flat, axis=-1, keepdims=True) * inv_n        # (B, 1)
    d = flat - mean
    var = jnp.sum(d * d, axis=-1, keepdims=True) * inv_n        # biased var
    y = d * lax.rsqrt(var + 1e-5)
    y = jnp.maximum(y * gamma_ref[...] + beta_ref[...], 0.0)    # affine + ReLU

    # --- fc MLP (Dropout = identity at inference) ----------------------------
    # Layer 1: bf16 operands (dominant weight), f32 accumulation.
    h = jnp.dot(y.astype(jnp.bfloat16), w1_ref[...],
                preferred_element_type=jnp.float32) + b1_ref[...]
    h = jnp.maximum(h, 0.0)
    h = jnp.dot(h, w2_ref[...],
                preferred_element_type=jnp.float32) + b2_ref[...]
    h = jnp.maximum(h, 0.0)                                     # (B, hidden)

    # --- fused heads: [p_delta | L_flat] in one matmul -----------------------
    # (tril scatter is folded into whead, so columns n.. are L in row-major)
    heads = jnp.dot(h, whead_ref[...],
                    preferred_element_type=jnp.float32) + bhead_ref[...]
    pd_ref[...] = heads[:, :n]                                  # (B, n)
    lflat = heads[:, n:]                                        # (B, n*n)

    # --- p_sigma = L @ L^T per sample, as ONE small matmul -------------------
    # Stack all rows of all L's as (B*n, n); the per-sample Grams are the
    # diagonal n x n blocks of (B*n, B*n).
    l_rows = jnp.concatenate(
        [lflat[b:b + 1, r * n:(r + 1) * n] for b in range(B) for r in range(n)],
        axis=0)                                                 # (B*n, n)
    gram = lax.dot_general(l_rows, l_rows, (((1,), (1,)), ((), ())),
                           preferred_element_type=jnp.float32)  # (B*n, B*n)
    for b in range(B):
        psig_ref[b] = gram[b * n:(b + 1) * n, b * n:(b + 1) * n]


# ---------------------------------------------------------------------------
# Wrapper (layout glue only: im2col, weight folding, repeats)
# ---------------------------------------------------------------------------
def _im2col_transposed(x_nchw):
    """patches_T[(kh*3+kw)*Cin + cin, b*H*W + h*W + w] = x_pad[b,cin,h+kh,w+kw]."""
    B, Cin, H, W = x_nchw.shape
    xp = jnp.pad(x_nchw, ((0, 0), (0, 0), (1, 1), (1, 1)))
    taps = []
    for kh in range(3):
        for kw in range(3):
            slab = xp[:, :, kh:kh + H, kw:kw + W]               # (B, Cin, H, W)
            taps.append(jnp.transpose(slab, (1, 0, 2, 3)).reshape(Cin, B * H * W))
    return jnp.concatenate(taps, axis=0)                        # (9*Cin, B*H*W)


def pose_gaussian_decoder(x_nchw, params):
    B, Cin, H, W = x_nchw.shape
    conv_w = params["conv_w"]                                   # (Cc, Cin, 3, 3)
    Cc = conv_w.shape[0]
    HW = H * W
    F = Cc * HW
    n = params["wd"].shape[-1]

    # im2col patches (transposed, lane-dense last dim)
    patches_t = _im2col_transposed(x_nchw.astype(jnp.float32))  # (9*Cin, B*HW)
    # conv weight as a single 2-D (Cc, 9*Cin) matrix, (kh, kw, cin) fastest cin
    w_conv = jnp.transpose(conv_w, (0, 2, 3, 1)).reshape(Cc, 9 * Cin)
    # GroupNorm affine repeated to the flat (c*HW + hw) order
    gamma_rep = jnp.repeat(params["gn_gamma"], HW).reshape(1, F)
    beta_rep = jnp.repeat(params["gn_beta"], HW).reshape(1, F)
    # fold tril scatter into the p_sigma head, fuse with the p_delta head
    ws_eff = params["ws"] @ params["tril_scatter"]               # (hidden, n*n)
    bs_eff = params["bs"] @ params["tril_scatter"]               # (1, n*n)
    w_head = jnp.concatenate([params["wd"], ws_eff], axis=1)     # (hidden, n+n*n)
    b_head = jnp.concatenate([params["bd"], bs_eff], axis=1)     # (1, n+n*n)

    vmem = pl.BlockSpec(memory_space=pltpu.MemorySpace.VMEM)
    pd, psig = pl.pallas_call(
        pose_decoder_kernel,
        out_shape=(jax.ShapeDtypeStruct((B, n), jnp.float32),
                   jax.ShapeDtypeStruct((B, n, n), jnp.float32)),
        in_specs=[vmem] * 10,
        out_specs=(vmem, vmem),
        compiler_params=pltpu.CompilerParams(vmem_limit_bytes=8 * 1024 * 1024),
    )(patches_t, w_conv, gamma_rep, beta_rep,
      params["w1"], params["b1"], params["w2"], params["b2"],
      w_head, b_head)

    return {"p_delta": pd, "p_sigma": psig}


# ---------------------------------------------------------------------------
# Deterministic parameter construction (synthetic init; no checkpoint load)
# ---------------------------------------------------------------------------
def init_params(key, in_channels, frame_size, after_flat=1024,
                hidden=(256, 256), num_out=4):
    H, W = frame_size
    Cc = after_flat // (H * W)
    ks = jax.random.split(key, 11)

    def rn(k, shape, s):
        return (s * jax.random.normal(k, shape)).astype(jnp.float32)

    p = {}
    p["conv_w"] = rn(ks[0], (Cc, in_channels, 3, 3), 0.1)        # OIHW (PyTorch)
    p["gn_gamma"] = (1.0 + 0.1 * jax.random.normal(ks[1], (Cc,))).astype(jnp.float32)
    p["gn_beta"] = rn(ks[2], (Cc,), 0.1)

    # Linear weights in (in, out) layout; rows of w1 follow PyTorch's (C,H,W)
    # flatten order.  w1 is stored in bf16 (kernel dtype); reference dequantizes.
    p["w1"] = rn(ks[3], (after_flat, hidden[0]), 0.05).astype(jnp.bfloat16)
    p["b1"] = rn(ks[4], (1, hidden[0]), 0.05)
    p["w2"] = rn(ks[5], (hidden[0], hidden[1]), 0.05)
    p["b2"] = rn(ks[6], (1, hidden[1]), 0.05)
    p["wd"] = rn(ks[7], (hidden[1], num_out), 0.05)
    p["bd"] = rn(ks[8], (1, num_out), 0.05)

    n_sig = (num_out + 1) * num_out // 2
    p["ws"] = rn(ks[9], (hidden[1], n_sig), 0.05)
    p["bs"] = rn(ks[10], (1, n_sig), 0.05)

    # tril scatter S: (n_sig, num_out*num_out), S[m, r*n + c] = 1 for the m-th
    # tril index (r, c) — same ordering as torch.tril_indices (row-major).
    tr, tc = np.tril_indices(num_out)
    S = np.zeros((n_sig, num_out * num_out), np.float32)
    for m, (r, c) in enumerate(zip(tr, tc)):
        S[m, r * num_out + c] = 1.0
    p["tril_scatter"] = jnp.asarray(S)
    return p


# ---------------------------------------------------------------------------
# Pure-JAX NCHW reference (mirrors the PyTorch forward) for verification
# ---------------------------------------------------------------------------
def reference_forward(x_nchw, p):
    B = x_nchw.shape[0]
    y = lax.conv_general_dilated(x_nchw, p["conv_w"], window_strides=(1, 1),
                                 padding=((1, 1), (1, 1)),
                                 dimension_numbers=("NCHW", "OIHW", "NCHW"))
    mean = jnp.mean(y, axis=(1, 2, 3), keepdims=True)
    var = jnp.mean((y - mean) ** 2, axis=(1, 2, 3), keepdims=True)
    y = (y - mean) * lax.rsqrt(var + 1e-5)
    y = y * p["gn_gamma"][None, :, None, None] + p["gn_beta"][None, :, None, None]
    y = jnp.maximum(y, 0.0)
    flat = y.reshape(B, -1)                                      # (C,H,W) order
    h = jnp.maximum(flat @ p["w1"].astype(jnp.float32) + p["b1"], 0.0)
    h = jnp.maximum(h @ p["w2"] + p["b2"], 0.0)
    pd = h @ p["wd"] + p["bd"]
    ps = h @ p["ws"] + p["bs"]
    num_out = p["wd"].shape[-1]
    tr, tc = np.tril_indices(num_out)
    trils = jnp.zeros((B, num_out, num_out), jnp.float32).at[:, tr, tc].set(ps)
    psig = jnp.einsum("bij,bkj->bik", trils, trils)
    return pd, psig


if __name__ == "__main__":
    key = jax.random.PRNGKey(0)
    k_x, k_p = jax.random.split(key)

    B, Cin, H, W = 2, 4, 16, 16            # -> 1024/(16*16) = 4 compression ch
    x = jax.random.normal(k_x, (B, Cin, H, W), jnp.float32)
    params = init_params(k_p, Cin, (H, W))

    out = jax.block_until_ready(pose_gaussian_decoder(x, params))

    ref_pd, ref_ps = reference_forward(x, params)
    np.testing.assert_allclose(np.asarray(out["p_delta"]), np.asarray(ref_pd),
                               rtol=2e-2, atol=2e-2)
    np.testing.assert_allclose(np.asarray(out["p_sigma"]), np.asarray(ref_ps),
                               rtol=2e-2, atol=2e-2)
    assert out["p_delta"].shape == (B, 4) and out["p_sigma"].shape == (B, 4, 4)
    print("KERNEL_OK")
</pallas_src>

<mosaic_0001>
module attributes {stable_mosaic.version = 11 : i64} {
  func.func @pose_decoder_kernel(%arg0: memref<36x512xf32, #tpu.memory_space<vmem>>, %arg1: memref<4x36xf32, #tpu.memory_space<vmem>>, %arg2: memref<1x1024xf32, #tpu.memory_space<vmem>>, %arg3: memref<1x1024xf32, #tpu.memory_space<vmem>>, %arg4: memref<1024x256xbf16, #tpu.memory_space<vmem>>, %arg5: memref<1x256xf32, #tpu.memory_space<vmem>>, %arg6: memref<256x256xf32, #tpu.memory_space<vmem>>, %arg7: memref<1x256xf32, #tpu.memory_space<vmem>>, %arg8: memref<256x20xf32, #tpu.memory_space<vmem>>, %arg9: memref<1x20xf32, #tpu.memory_space<vmem>>, %arg10: memref<2x4xf32, #tpu.memory_space<vmem>>, %arg11: memref<2x4x4xf32, #tpu.memory_space<vmem>>) attributes {dimension_semantics = [], scalar_prefetch = 0 : i64, scratch_operands = 0 : i64, tpu.core_type = #tpu.core_type<tc>} {
    %c0 = arith.constant 0 : index
    %c0_0 = arith.constant 0 : index
    %0 = vector.load %arg1[%c0, %c0_0] : memref<4x36xf32, #tpu.memory_space<vmem>>, vector<4x36xf32>
    %c0_1 = arith.constant 0 : index
    %c0_2 = arith.constant 0 : index
    %1 = vector.load %arg0[%c0_1, %c0_2] : memref<36x512xf32, #tpu.memory_space<vmem>>, vector<36x512xf32>
    %cst = arith.constant dense<0.000000e+00> : vector<4x512xf32>
    %2 = tpu.matmul %0, %1, %cst {dimension_numbers = #tpu.dot_dimension_numbers<[1], [0], [0], [1], [0, 0, 1, 1], [], []>} : vector<4x36xf32>, vector<36x512xf32>, vector<4x512xf32> -> vector<4x512xf32>
    %3 = vector.extract_strided_slice %2 {offsets = [0, 0], sizes = [1, 256], strides = [1, 1]} : vector<4x512xf32> to vector<1x256xf32>
    %4 = vector.extract_strided_slice %2 {offsets = [1, 0], sizes = [1, 256], strides = [1, 1]} : vector<4x512xf32> to vector<1x256xf32>
    %5 = vector.extract_strided_slice %2 {offsets = [2, 0], sizes = [1, 256], strides = [1, 1]} : vector<4x512xf32> to vector<1x256xf32>
    %6 = vector.extract_strided_slice %2 {offsets = [3, 0], sizes = [1, 256], strides = [1, 1]} : vector<4x512xf32> to vector<1x256xf32>
    %7 = tpu.concatenate %3, %4, %5, %6 in 1 : vector<1x256xf32>, vector<1x256xf32>, vector<1x256xf32>, vector<1x256xf32> -> vector<1x1024xf32>
    %8 = vector.extract_strided_slice %2 {offsets = [0, 256], sizes = [1, 256], strides = [1, 1]} : vector<4x512xf32> to vector<1x256xf32>
    %9 = vector.extract_strided_slice %2 {offsets = [1, 256], sizes = [1, 256], strides = [1, 1]} : vector<4x512xf32> to vector<1x256xf32>
    %10 = vector.extract_strided_slice %2 {offsets = [2, 256], sizes = [1, 256], strides = [1, 1]} : vector<4x512xf32> to vector<1x256xf32>
    %11 = vector.extract_strided_slice %2 {offsets = [3, 256], sizes = [1, 256], strides = [1, 1]} : vector<4x512xf32> to vector<1x256xf32>
    %12 = tpu.concatenate %8, %9, %10, %11 in 1 : vector<1x256xf32>, vector<1x256xf32>, vector<1x256xf32>, vector<1x256xf32> -> vector<1x1024xf32>
    %13 = tpu.concatenate %7, %12 in 0 : vector<1x1024xf32>, vector<1x1024xf32> -> vector<2x1024xf32>
    %cst_3 = arith.constant dense<0.000000e+00> : vector<2xf32>
    %14 = vector.multi_reduction <add>, %13, %cst_3 [1] : vector<2x1024xf32> to vector<2xf32>
    %15 = vector.shape_cast %14 : vector<2xf32> to vector<2x1xf32>
    %cst_4 = arith.constant 9.765625E-4 : f32
    %16 = vector.broadcast %cst_4 : f32 to vector<2x1xf32>
    %17 = arith.mulf %15, %16 : vector<2x1xf32>
    %18 = vector.broadcast %17 : vector<2x1xf32> to vector<2x1024xf32>
    %19 = arith.subf %13, %18 : vector<2x1024xf32>
    %20 = arith.mulf %19, %19 : vector<2x1024xf32>
    %cst_5 = arith.constant dense<0.000000e+00> : vector<2xf32>
    %21 = vector.multi_reduction <add>, %20, %cst_5 [1] : vector<2x1024xf32> to vector<2xf32>
    %22 = vector.shape_cast %21 : vector<2xf32> to vector<2x1xf32>
    %cst_6 = arith.constant 9.765625E-4 : f32
    %23 = vector.broadcast %cst_6 : f32 to vector<2x1xf32>
    %24 = arith.mulf %22, %23 : vector<2x1xf32>
    %cst_7 = arith.constant 9.99999974E-6 : f32
    %25 = vector.broadcast %cst_7 : f32 to vector<2x1xf32>
    %26 = arith.addf %24, %25 : vector<2x1xf32>
    %27 = math.rsqrt %26 : vector<2x1xf32>
    %28 = vector.broadcast %27 : vector<2x1xf32> to vector<2x1024xf32>
    %29 = arith.mulf %19, %28 : vector<2x1024xf32>
    %c0_8 = arith.constant 0 : index
    %c0_9 = arith.constant 0 : index
    %30 = vector.load %arg2[%c0_8, %c0_9] : memref<1x1024xf32, #tpu.memory_space<vmem>>, vector<1x1024xf32>
    %31 = vector.broadcast %30 : vector<1x1024xf32> to vector<2x1024xf32>
    %32 = arith.mulf %29, %31 : vector<2x1024xf32>
    %c0_10 = arith.constant 0 : index
    %c0_11 = arith.constant 0 : index
    %33 = vector.load %arg3[%c0_10, %c0_11] : memref<1x1024xf32, #tpu.memory_space<vmem>>, vector<1x1024xf32>
    %34 = vector.broadcast %33 : vector<1x1024xf32> to vector<2x1024xf32>
    %35 = arith.addf %32, %34 : vector<2x1024xf32>
    %cst_12 = arith.constant 0.000000e+00 : f32
    %36 = vector.broadcast %cst_12 : f32 to vector<2x1024xf32>
    %37 = arith.maximumf %35, %36 : vector<2x1024xf32>
    %38 = arith.truncf %37 : vector<2x1024xf32> to vector<2x1024xbf16>
    %c0_13 = arith.constant 0 : index
    %c0_14 = arith.constant 0 : index
    %39 = vector.load %arg4[%c0_13, %c0_14] : memref<1024x256xbf16, #tpu.memory_space<vmem>>, vector<1024x256xbf16>
    %cst_15 = arith.constant dense<0.000000e+00> : vector<2x256xf32>
    %40 = tpu.matmul %38, %39, %cst_15 {dimension_numbers = #tpu.dot_dimension_numbers<[1], [0], [0], [1], [0, 0, 1, 1], [], []>} : vector<2x1024xbf16>, vector<1024x256xbf16>, vector<2x256xf32> -> vector<2x256xf32>
    %c0_16 = arith.constant 0 : index
    %c0_17 = arith.constant 0 : index
    %41 = vector.load %arg5[%c0_16, %c0_17] : memref<1x256xf32, #tpu.memory_space<vmem>>, vector<1x256xf32>
    %42 = vector.broadcast %41 : vector<1x256xf32> to vector<2x256xf32>
    %43 = arith.addf %40, %42 : vector<2x256xf32>
    %cst_18 = arith.constant 0.000000e+00 : f32
    %44 = vector.broadcast %cst_18 : f32 to vector<2x256xf32>
    %45 = arith.maximumf %43, %44 : vector<2x256xf32>
    %c0_19 = arith.constant 0 : index
    %c0_20 = arith.constant 0 : index
    %46 = vector.load %arg6[%c0_19, %c0_20] : memref<256x256xf32, #tpu.memory_space<vmem>>, vector<256x256xf32>
    %cst_21 = arith.constant dense<0.000000e+00> : vector<2x256xf32>
    %47 = tpu.matmul %45, %46, %cst_21 {dimension_numbers = #tpu.dot_dimension_numbers<[1], [0], [0], [1], [0, 0, 1, 1], [], []>} : vector<2x256xf32>, vector<256x256xf32>, vector<2x256xf32> -> vector<2x256xf32>
    %c0_22 = arith.constant 0 : index
    %c0_23 = arith.constant 0 : index
    %48 = vector.load %arg7[%c0_22, %c0_23] : memref<1x256xf32, #tpu.memory_space<vmem>>, vector<1x256xf32>
    %49 = vector.broadcast %48 : vector<1x256xf32> to vector<2x256xf32>
    %50 = arith.addf %47, %49 : vector<2x256xf32>
    %cst_24 = arith.constant 0.000000e+00 : f32
    %51 = vector.broadcast %cst_24 : f32 to vector<2x256xf32>
    %52 = arith.maximumf %50, %51 : vector<2x256xf32>
    %c0_25 = arith.constant 0 : index
    %c0_26 = arith.constant 0 : index
    %53 = vector.load %arg8[%c0_25, %c0_26] : memref<256x20xf32, #tpu.memory_space<vmem>>, vector<256x20xf32>
    %cst_27 = arith.constant dense<0.000000e+00> : vector<2x20xf32>
    %54 = tpu.matmul %52, %53, %cst_27 {dimension_numbers = #tpu.dot_dimension_numbers<[1], [0], [0], [1], [0, 0, 1, 1], [], []>} : vector<2x256xf32>, vector<256x20xf32>, vector<2x20xf32> -> vector<2x20xf32>
    %c0_28 = arith.constant 0 : index
    %c0_29 = arith.constant 0 : index
    %55 = vector.load %arg9[%c0_28, %c0_29] : memref<1x20xf32, #tpu.memory_space<vmem>>, vector<1x20xf32>
    %56 = vector.broadcast %55 : vector<1x20xf32> to vector<2x20xf32>
    %57 = arith.addf %54, %56 : vector<2x20xf32>
    %58 = vector.extract_strided_slice %57 {offsets = [0, 0], sizes = [2, 4], strides = [1, 1]} : vector<2x20xf32> to vector<2x4xf32>
    %c0_30 = arith.constant 0 : index
    %c0_31 = arith.constant 0 : index
    %59 = vector.load %arg10[%c0_30, %c0_31] : memref<2x4xf32, #tpu.memory_space<vmem>>, vector<2x4xf32>
    tpu.vector_store %arg10[%c0_30, %c0_31], %58 {strides = array<i32>} : memref<2x4xf32, #tpu.memory_space<vmem>>, vector<2x4xf32>,
    %60 = vector.extract_strided_slice %57 {offsets = [0, 4], sizes = [2, 16], strides = [1, 1]} : vector<2x20xf32> to vector<2x16xf32>
    %61 = vector.extract_strided_slice %60 {offsets = [0, 0], sizes = [1, 4], strides = [1, 1]} : vector<2x16xf32> to vector<1x4xf32>
    %62 = vector.extract_strided_slice %60 {offsets = [0, 4], sizes = [1, 4], strides = [1, 1]} : vector<2x16xf32> to vector<1x4xf32>
    %63 = vector.extract_strided_slice %60 {offsets = [0, 8], sizes = [1, 4], strides = [1, 1]} : vector<2x16xf32> to vector<1x4xf32>
    %64 = vector.extract_strided_slice %60 {offsets = [0, 12], sizes = [1, 4], strides = [1, 1]} : vector<2x16xf32> to vector<1x4xf32>
    %65 = vector.extract_strided_slice %60 {offsets = [1, 0], sizes = [1, 4], strides = [1, 1]} : vector<2x16xf32> to vector<1x4xf32>
    %66 = vector.extract_strided_slice %60 {offsets = [1, 4], sizes = [1, 4], strides = [1, 1]} : vector<2x16xf32> to vector<1x4xf32>
    %67 = vector.extract_strided_slice %60 {offsets = [1, 8], sizes = [1, 4], strides = [1, 1]} : vector<2x16xf32> to vector<1x4xf32>
    %68 = vector.extract_strided_slice %60 {offsets = [1, 12], sizes = [1, 4], strides = [1, 1]} : vector<2x16xf32> to vector<1x4xf32>
    %69 = tpu.concatenate %61, %62, %63, %64, %65, %66, %67, %68 in 0 : vector<1x4xf32>, vector<1x4xf32>, vector<1x4xf32>, vector<1x4xf32>, vector<1x4xf32>, vector<1x4xf32>, vector<1x4xf32>, vector<1x4xf32> -> vector<8x4xf32>
    %cst_32 = arith.constant dense<0.000000e+00> : vector<8x8xf32>
    %70 = tpu.matmul %69, %69, %cst_32 {dimension_numbers = #tpu.dot_dimension_numbers<[1], [1], [0], [0], [0, 0, 1, 0], [], []>} : vector<8x4xf32>, vector<8x4xf32>, vector<8x8xf32> -> vector<8x8xf32>
    %71 = vector.extract_strided_slice %70 {offsets = [0, 0], sizes = [4, 4], strides = [1, 1]} : vector<8x8xf32> to vector<4x4xf32>
    %c0_33 = arith.constant 0 : index
    %c0_34 = arith.constant 0 : index
    %c0_35 = arith.constant 0 : index
    %72 = vector.load %arg11[%c0_33, %c0_34, %c0_35] : memref<2x4x4xf32, #tpu.memory_space<vmem>>, vector<1x4x4xf32>
    %73 = vector.shape_cast %72 : vector<1x4x4xf32> to vector<4x4xf32>
    %74 = vector.shape_cast %71 : vector<4x4xf32> to vector<1x4x4xf32>
    tpu.vector_store %arg11[%c0_33, %c0_34, %c0_35], %74 {strides = array<i32>} : memref<2x4x4xf32, #tpu.memory_space<vmem>>, vector<1x4x4xf32>,
    %75 = vector.extract_strided_slice %70 {offsets = [4, 4], sizes = [4, 4], strides = [1, 1]} : vector<8x8xf32> to vector<4x4xf32>
    %c1 = arith.constant 1 : index
    %c0_36 = arith.constant 0 : index
    %c0_37 = arith.constant 0 : index
    %76 = vector.load %arg11[%c1, %c0_36, %c0_37] : memref<2x4x4xf32, #tpu.memory_space<vmem>>, vector<1x4x4xf32>
    %77 = vector.shape_cast %76 : vector<1x4x4xf32> to vector<4x4xf32>
    %78 = vector.shape_cast %75 : vector<4x4xf32> to vector<1x4x4xf32>
    tpu.vector_store %arg11[%c1, %c0_36, %c0_37], %78 {strides = array<i32>} : memref<2x4x4xf32, #tpu.memory_space<vmem>>, vector<1x4x4xf32>,
    return
  }
}

</mosaic_0001>

<bundles_post_ra>
// kernel: tpu_custom_call.1
= control target key start
LH: loop header
LB: loop body
LE: loop exit
PB: predicated region body
PF: predicated region fallthrough
CT: control target
= control target key end

     0   :  { %17 = vsyncpa [#allocation3], 0  ;;  %s2876_s0 = inlined_call_operand.vmem [shape: f32[36,512], index: 0, kind: input, shape index: {}]   ;;  %s2877_s1 = inlined_call_operand.vmem [shape: f32[4,36], index: 1, kind: input, shape index: {}]   ;;  %s2878_s2 = inlined_call_operand.vmem [shape: f32[1,1024], index: 2, kind: input, shape index: {}]   ;;  %s2879_s3 = inlined_call_operand.vmem [shape: f32[1,1024], index: 3, kind: input, shape index: {}]   ;;  %s2880_s4 = inlined_call_operand.hbm [shape: bf16[1024,256], index: 4, kind: input, shape index: {}]   ;;  %s2881_s5 = inlined_call_operand.vmem [shape: f32[1,256], index: 5, kind: input, shape index: {}]   ;;  %s2882_s6 = inlined_call_operand.hbm [shape: f32[256,256], index: 6, kind: input, shape index: {}]   ;;  %s2883_s7 = inlined_call_operand.vmem [shape: f32[1,256], index: 7, kind: input, shape index: {}]   ;;  %s2884_s8 = inlined_call_operand.vmem [shape: f32[256,20], index: 8, kind: input, shape index: {}]   ;;  %s2885_s9 = inlined_call_operand.vmem [shape: f32[1,20], index: 9, kind: input, shape index: {}]   ;;  %s2886_s10 = inlined_call_operand.hbm [shape: f32[2,4], index: 10, kind: output, shape index: {0}]   ;;  %s2887_s11 = inlined_call_operand.hbm [shape: f32[2,4,4], index: 11, kind: output, shape index: {1}]  }
   0x1   :  { %18 = vsyncpa [#allocation6], 0 }
   0x2   :  { %19 = vsyncpa [#allocation4], 0 }
   0x3   :  { %20 = vsyncpa [#allocation9], 0  ;;  %s2447_s17 = smov [#allocation2]   ;;  %s2351_s21 = scalar_lea.hbm %s2880_s4, 16384 }
   0x4   :  { %s34_s18 = sshll.u32 %s2447_s17, 4  ;;  %p2352_p0 = scmp.ne.s32.totalorder %s2880_s4, %s2351_s21  ;;  %s35_s18 = int_to_ptr.vmem [resolvable:$true] %s34_s18 }
   0x5   :  { %p2355_p1 = scmp.lt.u32.totalorder %s2351_s21, %s2880_s4 }
   0x7   :  { %p2357_p2 = pnand %p2355_p1, %p2352_p0 }
   0x9   :  { %2360 = shalt.err (!%p2357_p2)
}
   0xa   :  { %s2361_s26 = scalar_lea.vmem %s35_s18, 16384  ;;  %p2366_p4 = scmp.lt.s32.totalorder %s35_s18, %s35_s18 }
   0xb   :  { %p2362_p3 = scmp.ne.s32.totalorder %s35_s18, %s2361_s26  ;;  %p2367_p5 = scmp.lt.s32.totalorder %s2361_s26, %s2361_s26 }
   0xd   :  { %p2368_p6 = por %p2367_p5, %p2366_p4 }
   0xf   :  { %p2369_p7 = pnand %p2368_p6, %p2362_p3 }
  0x11   :  { %2372 = shalt.err (!%p2369_p7)
}
  0x12   :  { %s2448_s27 = smov 128   ;;  %s2449_s28 = smov 8  }
  0x13   :  { %40 = dma.hbm_to_vmem [thread:$0]  %s2880_s4, 16384, %s35_s18, [#allocation3], %s2448_s27, %s2448_s27, %s2449_s28  }
  0x14   :  { %s2450_s12 = smov [#allocation5]   ;;  %s2373_s16 = scalar_lea.hbm %s2882_s6, 8192 }
  0x15   :  { %s48_s13 = sshll.u32 %s2450_s12, 4  ;;  %p2374_p8 = scmp.ne.s32.totalorder %s2882_s6, %s2373_s16  ;;  %s49_s13 = int_to_ptr.vmem [resolvable:$true] %s48_s13 }
  0x16   :  { %p2377_p9 = scmp.lt.u32.totalorder %s2373_s16, %s2882_s6 }
  0x18   :  { %p2379_p10 = pnand %p2377_p9, %p2374_p8 }
  0x1a   :  { %2382 = shalt.err (!%p2379_p10)
}
  0x1b   :  { %s2383_s22 = scalar_lea.vmem %s49_s13, 8192  ;;  %p2388_p12 = scmp.lt.s32.totalorder %s49_s13, %s49_s13 }
  0x1c   :  { %p2384_p11 = scmp.ne.s32.totalorder %s49_s13, %s2383_s22  ;;  %p2389_p13 = scmp.lt.s32.totalorder %s2383_s22, %s2383_s22 }
  0x1e   :  { %p2390_p0 = por %p2389_p13, %p2388_p12 }
  0x20   :  { %p2391_p1 = pnand %p2390_p0, %p2384_p11 }
  0x22   :  { %2394 = shalt.err (!%p2391_p1)
}
  0x23   :  { %s2451_s4 = smov 256   ;;  %s2452_s18 = smov 16  }
  0x24   :  { %54 = dma.hbm_to_vmem [thread:$0]  %s2882_s6, 8192, %s49_s13, [#allocation6], %s2451_s4, %s2451_s4, %s2452_s18  }
  0x25   :  { %2439 = dma.done.wait [#allocation3], 16384  }
  0x26   :  { %2440 = vsyncadd [#allocation3], 4294950912 }
  0x27   :  { %2441 = dma.done.wait [#allocation6], 8192  }
  0x28   :  { %2442 = vsyncadd [#allocation6], 4294959104  ;;  %v2453_v0 = vmov 0.0   ;;  %v69_v1 = vld [vmem:[%s2876_s0 + $0x8] sm:$0xff]  ;;  %v68_v3 = vld [vmem:[%s2876_s0] sm:$0xff]  ;;  %vm92_vm0 = vcmask 1043456  }
  0x29   :  { %169 = vmatprep.mubr.f32.mxu1 %v2453_v0  ;;  %v73_v2 = vld [vmem:[%s2876_s0 + $0x28] sm:$0xff]  ;;  %v72_v5 = vld [vmem:[%s2876_s0 + $0x20] sm:$0xff]  ;;  %v71_v14 = vld [vmem:[%s2876_s0 + $0x18] sm:$0xff]  ;;  %vm88_vm1 = vcmask 293888   ;;  %vm285_vm2 = vcmask 1040384   ;;  %vm294_vm3 = vcmask 1041408  }
  0x2a   :  { %v2018_v4 = vpack.c.bf16 %v73_v2, %v69_v1  ;;  %v77_v6 = vld [vmem:[%s2876_s0 + $0x48] sm:$0xff]  ;;  %v2020_v8 = vpack.c.bf16 %v72_v5, %v68_v3  ;;  %v76_v10 = vld [vmem:[%s2876_s0 + $0x40] sm:$0xff]  ;;  %v75_v15 = vld [vmem:[%s2876_s0 + $0x38] sm:$0xff]  ;;  %vm1677_vm4 = vcmask 25600   ;;  %s2455_s22 = smov 124   ;;  %vm1707_vm5 = vcmask 1042432  }
  0x2b   :  { %v81_v7 = vld [vmem:[%s2876_s0 + $0x68] sm:$0xff]  ;;  %v80_v11 = vld [vmem:[%s2876_s0 + $0x60] sm:$0xff]  ;;  %v70_v16 = vld [vmem:[%s2876_s0 + $0x10] sm:$0xff]  ;;  %v2026_v22 = vpack.c.bf16 %v75_v15, %v71_v14  ;;  %vm2457_vm6 = vmmov 0   ;;  %vm1710_vm7 = vcmask 1044480   ;;  %vm1712_vm8 = vcmask 1045504  }
  0x2c   :  { %v2022_v9 = vpack.c.bf16 %v81_v7, %v77_v6  ;;  %2019 = vmatprep.subr.bf16.mxu1 %v2018_v4  ;;  %v2024_v12 = vpack.c.bf16 %v80_v11, %v76_v10  ;;  %v85_v13 = vld [vmem:[%s2876_s0 + $0x88] sm:$0xf]  ;;  %v74_v17 = vld [vmem:[%s2876_s0 + $0x30] sm:$0xff]  ;;  %v79_v18 = vld [vmem:[%s2876_s0 + $0x58] sm:$0xff]  ;;  %vm1714_vm9 = vcmask 1046528   ;;  %vm1719_vm10 = vcmask 31744  }
  0x2d   :  { %2021 = vmatpush1.bf16.msra.mxu1 %v2020_v8  ;;  %v83_v19 = vld [vmem:[%s2876_s0 + $0x78] sm:$0xff]  ;;  %v84_v20 = vld [vmem:[%s2876_s0 + $0x80] sm:$0xf]  ;;  %v78_v23 = vld [vmem:[%s2876_s0 + $0x50] sm:$0xff]  ;;  %v2028_v25 = vpack.c.bf16 %v74_v17, %v70_v16 }
  0x2e   :  { %2023 = vmatprep.subr.bf16.mxu1 %v2022_v9  ;;  %v67_v21 = vld [vmem:[%s2877_s1] sm:$0xf]  ;;  %v82_v24 = vld [vmem:[%s2876_s0 + $0x70] sm:$0xff]  ;;  %v2030_v26 = vpack.c.bf16 %v83_v19, %v79_v18  ;;  %v87_v28 = vld [vmem:[%s2876_s0 + $0x98] sm:$0xf]  ;;  %s2456_s1 = smov 120  }
  0x2f   :  { %v2032_v27 = vpack.c.bf16 %v82_v24, %v78_v23  ;;  %v86_v29 = vld [vmem:[%s2876_s0 + $0x90] sm:$0xf]  ;;  %v2157_v6 = vld [vmem:[#allocation2 + $0x104] ss:$8 sps:$4 sm:$0xff]   ;;  %v2159_v7 = vld [vmem:[#allocation2] ss:$8 sps:$4 sm:$0xff]  }
  0x30   :  { %v2161_v8 = vld [vmem:[#allocation2 + $0x4] ss:$8 sps:$4 sm:$0xff]   ;;  %v2162_v9 = vld [vmem:[#allocation2 + $0x100] ss:$8 sps:$4 sm:$0xff]   ;;  %v2163_v10 = vld [vmem:[#allocation2 + $0x114] ss:$8 sps:$4 sm:$0xff]   ;;  %1294 = vmatprep.subr.bf16.mxu0 %v2157_v6 }
  0x31   :  { %2025 = vmatpush1.bf16.msra.mxu1 %v2024_v12  ;;  %v2167_v11 = vld [vmem:[#allocation2 + $0x14] ss:$8 sps:$4 sm:$0xff]   ;;  %1295 = vmatpush1.bf16.msra.mxu0 %v2162_v9  ;;  %v2165_v12 = vld [vmem:[#allocation2 + $0x10] ss:$8 sps:$4 sm:$0xff]   ;;  %v2169_v14 = vld [vmem:[#allocation2 + $0x124] ss:$8 sps:$4 sm:$0xff]  }
  0x32   :  { %1833 = vmatprep.subr.msk.mxu1 %vm92_vm0, %v85_v13  ;;  %v2168_v13 = vld [vmem:[#allocation2 + $0x110] ss:$8 sps:$4 sm:$0xff]   ;;  %1296 = vmatprep.subr.bf16.mxu0 %v2163_v10  ;;  %v2173_v15 = vld [vmem:[#allocation2 + $0x24] ss:$8 sps:$4 sm:$0xff]   ;;  %v2171_v16 = vld [vmem:[#allocation2 + $0x20] ss:$8 sps:$4 sm:$0xff]  }
  0x33   :  { %v2174_v17 = vld [vmem:[#allocation2 + $0x120] ss:$8 sps:$4 sm:$0xff]   ;;  %v2175_v18 = vld [vmem:[#allocation2 + $0x134] ss:$8 sps:$4 sm:$0xff]   ;;  %v2185_v23 = vld [vmem:[#allocation2 + $0x44] ss:$8 sps:$4 sm:$0xff]  }
  0x34   :  { %v2179_v19 = vld [vmem:[#allocation2 + $0x34] ss:$8 sps:$4 sm:$0xff]   ;;  %v2183_v24 = vld [vmem:[#allocation2 + $0x40] ss:$8 sps:$4 sm:$0xff]  }
  0x35   :  { %1834 = vmatpush1.msk.msra.mxu1 %vm92_vm0, %v84_v20  ;;  %1297 = vmatpush1.bf16.msra.mxu0 %v2168_v13  ;;  %v2177_v20 = vld [vmem:[#allocation2 + $0x30] ss:$8 sps:$4 sm:$0xff]  }
  0x36   :  { %1835 = vmatmul.mubr.msk.f32.vlgmr.msra.gmra.mrb[0].mxu1 %vm88_vm1, %v67_v21  ;;  %2027 = vmatprep.subr.bf16.mxu1 %v2026_v22  ;;  %v2181_v22 = vld [vmem:[#allocation2 + $0x144] ss:$8 sps:$4 sm:$0xff]  }
  0x37   :  { %2029 = vmatpush1.bf16.msra.mxu1 %v2028_v25  ;;  %240 = vmatprep.mubr.f32.mxu1 %v2453_v0  ;;  %v2186_v25 = vld [vmem:[#allocation2 + $0x140] ss:$8 sps:$4 sm:$0xff]  }
  0x38   :  { %2031 = vmatprep.subr.bf16.mxu1 %v2030_v26  ;;  %1298 = vmatprep.subr.bf16.mxu0 %v2169_v14  ;;  %v2187_v26 = vld [vmem:[#allocation2 + $0x154] ss:$8 sps:$4 sm:$0xff]  }
  0x39   :  { %1299 = vmatpush1.bf16.msra.mxu0 %v2174_v17  ;;  %v2221_v17 = vld [vmem:[#allocation2 + $0xa4] ss:$8 sps:$4 sm:$0xff]  }
  0x3a   :  { %1300 = vmatprep.subr.bf16.mxu0 %v2175_v18  ;;  %v2222_v18 = vld [vmem:[#allocation2 + $0x1a0] ss:$8 sps:$4 sm:$0xff]  }
  0x3b   :  { %2033 = vmatpush1.bf16.msra.mxu1 %v2032_v27  ;;  %v2191_v27 = vld [vmem:[#allocation2 + $0x54] ss:$8 sps:$4 sm:$0xff]  }
  0x3c   :  { %1836 = vmatprep.subr.msk.mxu1 %vm92_vm0, %v87_v28  ;;  %v2189_v28 = vld [vmem:[#allocation2 + $0x50] ss:$8 sps:$4 sm:$0xff]  }
  0x3f   :  { %1837 = vmatpush1.msk.msra.mxu1 %vm92_vm0, %v86_v29  ;;  %v2192_v29 = vld [vmem:[#allocation2 + $0x150] ss:$8 sps:$4 sm:$0xff]  }
  0x40   :  { %1838 = vmatmul.mubr.msk.f32.vlgmr.msra.gmra.mrb[2].mxu1 %vm88_vm1, %v67_v21  ;;  %1253 = vmatprep.subr.bf16.mxu1 %v2161_v8  ;;  %v2180_v21 = vld [vmem:[#allocation2 + $0x130] ss:$8 sps:$4 sm:$0xff]  }
  0x41   :  { %1254 = vmatpush1.bf16.msra.mxu1 %v2159_v7  ;;  %1301 = vmatpush1.bf16.msra.mxu0 %v2180_v21  ;;  %v2227_v21 = vld [vmem:[#allocation2 + $0xb4] ss:$8 sps:$4 sm:$0xff]  }
  0x42   :  { %1255 = vmatprep.subr.bf16.mxu1 %v2167_v11  ;;  %1302 = vmatprep.subr.bf16.mxu0 %v2181_v22  ;;  %v2225_v22 = vld [vmem:[#allocation2 + $0xb0] ss:$8 sps:$4 sm:$0xff]  }
  0x45   :  { %1256 = vmatpush1.bf16.msra.mxu1 %v2165_v12  ;;  %1303 = vmatpush1.bf16.msra.mxu0 %v2186_v25  ;;  %v2233_v25 = vld [vmem:[#allocation2 + $0xc4] ss:$8 sps:$4 sm:$0xff]  }
  0x46   :  { %1257 = vmatprep.subr.bf16.mxu1 %v2173_v15  ;;  %1304 = vmatprep.subr.bf16.mxu0 %v2187_v26  ;;  %v2234_v26 = vld [vmem:[#allocation2 + $0x1c0] ss:$8 sps:$4 sm:$0xff]  }
  0x49   :  { %1258 = vmatpush1.bf16.msra.mxu1 %v2171_v16  ;;  %1305 = vmatpush1.bf16.msra.mxu0 %v2192_v29  ;;  %v2217_v16 = vld [vmem:[#allocation2 + $0x1a4] ss:$8 sps:$4 sm:$0xff]   ;;  %v2239_v29 = vld [vmem:[#allocation2 + $0xd4] ss:$8 sps:$4 sm:$0xff]  }
  0x4a   :  { %1259 = vmatprep.subr.bf16.mxu1 %v2179_v19  ;;  %v2219_v19 = vld [vmem:[#allocation2 + $0xa0] ss:$8 sps:$4 sm:$0xff]  }
  0x4d   :  { %1260 = vmatpush1.bf16.msra.mxu1 %v2177_v20  ;;  %v2223_v20 = vld [vmem:[#allocation2 + $0x1b4] ss:$8 sps:$4 sm:$0xff]  }
  0x4e   :  { %1261 = vmatprep.subr.bf16.mxu1 %v2185_v23  ;;  %v2228_v23 = vld [vmem:[#allocation2 + $0x1b0] ss:$8 sps:$4 sm:$0xff]  }
  0x51   :  { %1262 = vmatpush1.bf16.msra.mxu1 %v2183_v24  ;;  %v2229_v24 = vld [vmem:[#allocation2 + $0x1c4] ss:$8 sps:$4 sm:$0xff]  }
  0x52   :  { %1263 = vmatprep.subr.bf16.mxu1 %v2191_v27  ;;  %v2231_v27 = vld [vmem:[#allocation2 + $0xc0] ss:$8 sps:$4 sm:$0xff]  }
  0x55   :  { %1264 = vmatpush1.bf16.msra.mxu1 %v2189_v28  ;;  %v2235_v28 = vld [vmem:[#allocation2 + $0x1d4] ss:$8 sps:$4 sm:$0xff]  }
 0x109   :  { %v171_v30 = vpop.f32.mrb[0].mxu1 }
 0x10a   :  { %v173_v31 = vpop.f32.mrb[1].mxu1  ;;  %v249_v32 = vrot.slane %v171_v30, 1  ;;  %v253_v33 = vrot.slane %v171_v30, 2  ;;  %v257_v34 = vrot.slane %v171_v30, 3 }
 0x10b   :  { %v250_v35 = vrot.slane %v173_v31, 1  ;;  %v254_v36 = vrot.slane %v173_v31, 2  ;;  %v258_v43 = vrot.slane %v173_v31, 3 }
 0x113   :  { %v242_v37 = vpop.f32.mrb[2].mxu1 }
 0x114   :  { %v269_v38 = vrot.slane %v242_v37, 7  ;;  %v1841_v39 = vrot.slane %v242_v37, 9  ;;  %v1843_v40 = vrot.slane %v242_v37, 10  ;;  %v2616_v41 = vsel %vm285_vm2, %v249_v32, %v242_v37  ;;  %v244_v42 = vpop.f32.mrb[3].mxu1  ;;  %v2195_v32 = vld [vmem:[#allocation2 + $0x60] ss:$8 sps:$4 sm:$0xff]  }
 0x115   :  { %v270_v44 = vrot.slane %v244_v42, 7  ;;  %v1842_v45 = vrot.slane %v244_v42, 9  ;;  %v1844_v46 = vrot.slane %v244_v42, 10  ;;  %v2622_v48 = vsel %vm285_vm2, %v250_v35, %v244_v42  ;;  %v2203_v35 = vld [vmem:[#allocation2 + $0x74] ss:$8 sps:$4 sm:$0xff]  }
 0x116   :  { %v2619_v47 = vsel %vm285_vm2, %v171_v30, %v269_v38  ;;  %v2625_v49 = vsel %vm285_vm2, %v253_v33, %v1841_v39  ;;  %v2628_v50 = vsel %vm285_vm2, %v257_v34, %v1843_v40  ;;  %v298_v57 = vsel %vm294_vm3, %v2616_v41, 0.0  ;;  %v2193_v30 = vld [vmem:[#allocation2 + $0x164] ss:$8 sps:$4 sm:$0xff]   ;;  %v2198_v33 = vld [vmem:[#allocation2 + $0x160] ss:$8 sps:$4 sm:$0xff]  }
 0x117   :  { %v295_v51 = vsel %vm294_vm3, %v2619_v47, 0.0  ;;  %v2633_v52 = vsel %vm285_vm2, %v173_v31, %v270_v44  ;;  %v2636_v53 = vsel %vm285_vm2, %v254_v36, %v1842_v45  ;;  %v2641_v55 = vsel %vm285_vm2, %v258_v43, %v1844_v46  ;;  %v2197_v31 = vld [vmem:[#allocation2 + $0x64] ss:$8 sps:$4 sm:$0xff]   ;;  %1306 = vmatprep.subr.bf16.mxu0 %v2193_v30  ;;  %v2199_v34 = vld [vmem:[#allocation2 + $0x174] ss:$8 sps:$4 sm:$0xff]  }
 0x118   :  { %v296_v54 = vsel %vm294_vm3, %v2633_v52, 0.0  ;;  %v300_v59 = vsel %vm294_vm3, %v2622_v48, 0.0  ;;  %v302_v61 = vsel %vm294_vm3, %v2625_v49, 0.0  ;;  %v304_v63 = vsel %vm294_vm3, %v2636_v53, 0.0  ;;  %1265 = vmatprep.subr.bf16.mxu1 %v2197_v31  ;;  %1307 = vmatpush1.bf16.msra.mxu0 %v2198_v33  ;;  %v2201_v36 = vld [vmem:[#allocation2 + $0x70] ss:$8 sps:$4 sm:$0xff]  }
 0x119   :  { %v297_v56 = vadd.f32 %v296_v54, %v295_v51  ;;  %v306_v2 = vsel %vm294_vm3, %v2628_v50, 0.0  ;;  %v308_v4 = vsel %vm294_vm3, %v2641_v55, 0.0  ;;  %1266 = vmatpush1.bf16.msra.mxu1 %v2195_v32  ;;  %v2204_v37 = vld [vmem:[#allocation2 + $0x170] ss:$8 sps:$4 sm:$0xff]   ;;  %1308 = vmatprep.subr.bf16.mxu0 %v2199_v34  ;;  %v2205_v38 = vld [vmem:[#allocation2 + $0x184] ss:$8 sps:$4 sm:$0xff]   ;;  %v359_v30 = vlaneseq }
 0x11a   :  { %1267 = vmatprep.subr.bf16.mxu1 %v2203_v35  ;;  %v2209_v39 = vld [vmem:[#allocation2 + $0x84] ss:$8 sps:$4 sm:$0xff]   ;;  %v2207_v40 = vld [vmem:[#allocation2 + $0x80] ss:$8 sps:$4 sm:$0xff]   ;;  %v2211_v43 = vld [vmem:[#allocation2 + $0x194] ss:$8 sps:$4 sm:$0xff]  }
 0x11b   :  { %v299_v58 = vadd.f32 %v298_v57, %v297_v56  ;;  %v2210_v42 = vld [vmem:[#allocation2 + $0x180] ss:$8 sps:$4 sm:$0xff]   ;;  %v2215_v44 = vld [vmem:[#allocation2 + $0x94] ss:$8 sps:$4 sm:$0xff]   ;;  %v2213_v45 = vld [vmem:[#allocation2 + $0x90] ss:$8 sps:$4 sm:$0xff]  }
 0x11c   :  { %1309 = vmatpush1.bf16.msra.mxu0 %v2204_v37  ;;  %v2216_v46 = vld [vmem:[#allocation2 + $0x190] ss:$8 sps:$4 sm:$0xff]   ;;  %v2241_v33 = vld [vmem:[#allocation2 + $0x1e4] ss:$8 sps:$4 sm:$0xff]   ;;  %v360_v34 = vshrl.u32 %v359_v30, 7 }
 0x11d   :  { %v301_v60 = vadd.f32 %v300_v59, %v299_v58  ;;  %1268 = vmatpush1.bf16.msra.mxu1 %v2201_v36  ;;  %1310 = vmatprep.subr.bf16.mxu0 %v2205_v38  ;;  %v2240_v31 = vld [vmem:[#allocation2 + $0x1d0] ss:$8 sps:$4 sm:$0xff]   ;;  %v2245_v35 = vld [vmem:[#allocation2 + $0xe4] ss:$8 sps:$4 sm:$0xff]   ;;  %v2246_v37 = vld [vmem:[#allocation2 + $0x1e0] ss:$8 sps:$4 sm:$0xff]  }
 0x11e   :  { %1269 = vmatprep.subr.bf16.mxu1 %v2209_v39  ;;  %v2237_v32 = vld [vmem:[#allocation2 + $0xd0] ss:$8 sps:$4 sm:$0xff]   ;;  %v357_v36 = vld [vmem:[%s2878_s2] sm:$0xff]  ;;  %v377_v38 = vsub.s32 4, %v360_v34  ;;  %v389_v39 = vsub.s32 7, %v360_v34 }
 0x11f   :  { %v303_v62 = vadd.f32 %v302_v61, %v301_v60 }
 0x120   :  { %1311 = vmatpush1.bf16.msra.mxu0 %v2210_v42  ;;  %v2243_v42 = vld [vmem:[#allocation2 + $0xe0] ss:$8 sps:$4 sm:$0xff]  }
 0x121   :  { %v305_v1 = vadd.f32 %v304_v63, %v303_v62  ;;  %1270 = vmatpush1.bf16.msra.mxu1 %v2207_v40  ;;  %1312 = vmatprep.subr.bf16.mxu0 %v2211_v43  ;;  %v385_v40 = vsub.s32 6, %v360_v34  ;;  %v2247_v43 = vld [vmem:[#allocation2 + $0x1f4] ss:$8 sps:$4 sm:$0xff]  }
 0x122   :  { %1271 = vmatprep.subr.bf16.mxu1 %v2215_v44  ;;  %v407_v44 = vld [vmem:[%s2879_s3] sm:$0xff] }
 0x123   :  { %v307_v3 = vadd.f32 %v306_v2, %v305_v1 }
 0x124   :  { %1313 = vmatpush1.bf16.msra.mxu0 %v2216_v46  ;;  %v378_v46 = vrot.slane %v357_v36, %v377_v38 }
 0x125   :  { %v309_v5 = vadd.f32 %v308_v4, %v307_v3  ;;  %1272 = vmatpush1.bf16.msra.mxu1 %v2213_v45  ;;  %1314 = vmatprep.subr.bf16.mxu0 %v2217_v16  ;;  %v2251_v45 = vld [vmem:[#allocation2 + $0xf4] ss:$8 sps:$4 sm:$0xff]  }
 0x126   :  { %1273 = vmatprep.subr.bf16.mxu1 %v2221_v17 }
 0x127   :  { %310 = vadd.xlane.f32.xlu0 %v309_v5 }
 0x128   :  { %1315 = vmatpush1.bf16.msra.mxu0 %v2222_v18 }
 0x129   :  { %1274 = vmatpush1.bf16.msra.mxu1 %v2219_v19  ;;  %1316 = vmatprep.subr.bf16.mxu0 %v2223_v20 }
 0x12a   :  { %1275 = vmatprep.subr.bf16.mxu1 %v2227_v21 }
 0x12c   :  { %1317 = vmatpush1.bf16.msra.mxu0 %v2228_v23 }
 0x12d   :  { %1276 = vmatpush1.bf16.msra.mxu1 %v2225_v22  ;;  %1318 = vmatprep.subr.bf16.mxu0 %v2229_v24 }
 0x12e   :  { %1277 = vmatprep.subr.bf16.mxu1 %v2233_v25 }
 0x130   :  { %1319 = vmatpush1.bf16.msra.mxu0 %v2234_v26 }
 0x131   :  { %1278 = vmatpush1.bf16.msra.mxu1 %v2231_v27  ;;  %1320 = vmatprep.subr.bf16.mxu0 %v2235_v28 }
 0x132   :  { %1279 = vmatprep.subr.bf16.mxu1 %v2239_v29 }
 0x134   :  { %1321 = vmatpush1.bf16.msra.mxu0 %v2240_v31 }
 0x135   :  { %1280 = vmatpush1.bf16.msra.mxu1 %v2237_v32  ;;  %1322 = vmatprep.subr.bf16.mxu0 %v2241_v33 }
 0x136   :  { %1281 = vmatprep.subr.bf16.mxu1 %v2245_v35 }
 0x138   :  { %1323 = vmatpush1.bf16.msra.mxu0 %v2246_v37 }
 0x139   :  { %1282 = vmatpush1.bf16.msra.mxu1 %v2243_v42  ;;  %1324 = vmatprep.subr.bf16.mxu0 %v2247_v43  ;;  %v2253_v42 = vld [vmem:[#allocation2 + $0x200] ss:$8 sps:$4 sm:$0xff]  }
 0x13a   :  { %1283 = vmatprep.subr.bf16.mxu1 %v2251_v45  ;;  %v2258_v45 = vld [vmem:[#allocation2 + $0x214] ss:$8 sps:$4 sm:$0xff]  }
 0x1b4   :  { %v311_v51 = vpop.xlane.xlu0 %310 }
 0x1b5   :  { %v312_v54 = vmul.f32 0.0009765625, %v311_v51  ;;  %v2252_v51 = vld [vmem:[#allocation2 + $0x1f0] ss:$8 sps:$4 sm:$0xff]  }
 0x1b6   :  { %1325 = vmatpush1.bf16.msra.mxu0 %v2252_v51  ;;  %v2256_v51 = vld [vmem:[#allocation2 + $0x210] ss:$8 sps:$4 sm:$0xff]  }
 0x1b7   :  { %v2656_v56 = vsub.f32 %v2619_v47, %v312_v54  ;;  %v2659_v57 = vsub.f32 %v2633_v52, %v312_v54  ;;  %v2662_v58 = vsub.f32 %v2616_v41, %v312_v54  ;;  %v2665_v59 = vsub.f32 %v2622_v48, %v312_v54 }
 0x1b8   :  { %v2668_v60 = vsub.f32 %v2625_v49, %v312_v54  ;;  %v2677_v52 = vsub.f32 %v2636_v53, %v312_v54  ;;  %v2684_v1 = vsub.f32 %v2628_v50, %v312_v54  ;;  %v2690_v53 = vsub.f32 %v2641_v55, %v312_v54 }
 0x1b9   :  { %v321_v61 = vmul.f32 %v2656_v56, %v2656_v56  ;;  %v322_v62 = vmul.f32 %v2659_v57, %v2659_v57  ;;  %v323_v47 = vmul.f32 %v2662_v58, %v2662_v58  ;;  %v324_v41 = vmul.f32 %v2665_v59, %v2665_v59 }
 0x1ba   :  { %v325_v2 = vmul.f32 %v2668_v60, %v2668_v60  ;;  %v326_v5 = vmul.f32 %v2677_v52, %v2677_v52  ;;  %v327_v8 = vmul.f32 %v2684_v1, %v2684_v1  ;;  %v328_v10 = vmul.f32 %v2690_v53, %v2690_v53 }
 0x1bb   :  { %v329_v48 = vsel %vm294_vm3, %v321_v61, 0.0  ;;  %v330_v49 = vsel %vm294_vm3, %v322_v62, 0.0  ;;  %v332_v3 = vsel %vm294_vm3, %v323_v47, 0.0  ;;  %v334_v6 = vsel %vm294_vm3, %v324_v41, 0.0  ;;  %v2249_v41 = vld [vmem:[#allocation2 + $0xf0] ss:$8 sps:$4 sm:$0xff]  }
 0x1bc   :  { %v331_v63 = vadd.f32 %v330_v49, %v329_v48  ;;  %v336_v50 = vsel %vm294_vm3, %v325_v2, 0.0  ;;  %v338_v11 = vsel %vm294_vm3, %v326_v5, 0.0  ;;  %v340_v55 = vsel %vm294_vm3, %v327_v8, 0.0  ;;  %1284 = vmatpush1.bf16.msra.mxu1 %v2249_v41  ;;  %v2255_v49 = vld [vmem:[#allocation2 + $0x204] ss:$8 sps:$4 sm:$0xff]  }
 0x1bd   :  { %v342_v14 = vsel %vm294_vm3, %v328_v10, 0.0  ;;  %v428_v54 = vrot.slane %v407_v44, %v377_v38  ;;  %v390_v61 = vrot.slane %v357_v36, %v389_v39  ;;  %v440_v62 = vrot.slane %v407_v44, %v389_v39  ;;  %1335 = vmatprep.subr.bf16.mxu0 %v2255_v49  ;;  %v2267_v41 = vld [vmem:[#allocation2 + $0x244] ss:$8 sps:$4 sm:$0xff]   ;;  %v2270_v49 = vld [vmem:[#allocation2 + $0x254] ss:$8 sps:$4 sm:$0xff]  }
 0x1be   :  { %v333_v4 = vadd.f32 %v332_v3, %v331_v63  ;;  %v386_v47 = vrot.slane %v357_v36, %v385_v40  ;;  %v436_v48 = vrot.slane %v407_v44, %v385_v40  ;;  %v373_v5 = vsub.s32 3, %v360_v34 }
 0x1bf   :  { %v381_v8 = vsub.s32 5, %v360_v34 }
 0x1c0   :  { %v335_v7 = vadd.f32 %v334_v6, %v333_v4  ;;  %v2709_v4 = vsub.s32 1, %v360_v34  ;;  %v2711_v6 = vsub.s32 0, %v360_v34 }
 0x1c1   :  { %v432_v17 = vrot.slane %v407_v44, %v381_v8 }
 0x1c2   :  { %v337_v9 = vadd.f32 %v336_v50, %v335_v7  ;;  %v369_v7 = vsub.s32 2, %v360_v34  ;;  %v366_v50 = vrot.slane %v357_v36, %v2709_v4  ;;  %v416_v10 = vrot.slane %v407_v44, %v2709_v4 }
 0x1c4   :  { %v339_v12 = vadd.f32 %v338_v11, %v337_v9  ;;  %v374_v9 = vrot.slane %v357_v36, %v373_v5  ;;  %v362_v11 = vrot.slane %v357_v36, %v2711_v6  ;;  %v420_v16 = vrot.slane %v407_v44, %v369_v7 }
 0x1c6   :  { %v341_v13 = vadd.f32 %v340_v55, %v339_v12  ;;  %v370_v12 = vrot.slane %v357_v36, %v369_v7  ;;  %v382_v55 = vrot.slane %v357_v36, %v381_v8  ;;  %v2274_v7 = vld [vmem:[#allocation2 + $0x270] ss:$8 sps:$4 sm:$0xff]   ;;  %v2279_v8 = vld [vmem:[#allocation2 + $0x284] ss:$8 sps:$4 sm:$0xff]  }
 0x1c8   :  { %v343_v15 = vadd.f32 %v342_v14, %v341_v13  ;;  %v424_v14 = vrot.slane %v407_v44, %v373_v5  ;;  %v2276_v5 = vld [vmem:[#allocation2 + $0x274] ss:$8 sps:$4 sm:$0xff]  }
 0x1ca   :  { %344 = vadd.xlane.f32.xlu0 %v343_v15  ;;  %v412_v15 = vrot.slane %v407_v44, %v2711_v6 }
 0x257   :  { %v345_v63 = vpop.xlane.xlu0 %344 }
 0x258   :  { %v346_v2 = vmul.f32 0.0009765625, %v345_v63  ;;  %v2268_v63 = vld [vmem:[#allocation2 + $0x250] ss:$8 sps:$4 sm:$0xff]  }
 0x25a   :  { %v347_v3 = vadd.f32 1e-05, %v346_v2  ;;  %v2273_v2 = vld [vmem:[#allocation2 + $0x264] ss:$8 sps:$4 sm:$0xff]  }
 0x25c   :  { %2349 = vrsqrt.f32 %v347_v3  ;;  %v2271_v3 = vld [vmem:[#allocation2 + $0x260] ss:$8 sps:$4 sm:$0xff]  }
 0x266   :  { %v2350_v13 = vpop.eup %2349 }
 0x267   :  { %v350_v18 = vmul.f32 %v2350_v13, %v2659_v57  ;;  %v352_v19 = vmul.f32 %v2350_v13, %v2665_v59  ;;  %v349_v20 = vmul.f32 %v2350_v13, %v2656_v56  ;;  %v351_v21 = vmul.f32 %v2350_v13, %v2662_v58 }
 0x268   :  { %v354_v22 = vmul.f32 %v2350_v13, %v2677_v52  ;;  %v353_v23 = vmul.f32 %v2350_v13, %v2668_v60  ;;  %v356_v24 = vmul.f32 %v2350_v13, %v2690_v53  ;;  %v355_v25 = vmul.f32 %v2350_v13, %v2684_v1  ;;  %v2286_v13 = vld [vmem:[#allocation2 + $0x2b0] ss:$8 sps:$4 sm:$0xff]  }
 0x269   :  { %v400_v26 = vmul.f32 %v366_v50, %v350_v18  ;;  %v402_v27 = vmul.f32 %v374_v9, %v352_v19  ;;  %v399_v28 = vmul.f32 %v362_v11, %v349_v20  ;;  %v401_v29 = vmul.f32 %v370_v12, %v351_v21  ;;  %v2277_v50 = vld [vmem:[#allocation2 + $0x280] ss:$8 sps:$4 sm:$0xff]   ;;  %v2282_v9 = vld [vmem:[#allocation2 + $0x294] ss:$8 sps:$4 sm:$0xff]   ;;  %v2285_v11 = vld [vmem:[#allocation2 + $0x2a4] ss:$8 sps:$4 sm:$0xff]  }
 0x26a   :  { %v404_v30 = vmul.f32 %v382_v55, %v354_v22  ;;  %v403_v57 = vmul.f32 %v378_v46, %v353_v23  ;;  %v406_v31 = vmul.f32 %v390_v61, %v356_v24  ;;  %v405_v59 = vmul.f32 %v386_v47, %v355_v25  ;;  %v2259_v61 = vld [vmem:[#allocation2 + $0x220] ss:$8 sps:$4 sm:$0xff]   ;;  %v2262_v47 = vld [vmem:[#allocation2 + $0x230] ss:$8 sps:$4 sm:$0xff]   ;;  %v2288_v55 = vld [vmem:[#allocation2 + $0x2b4] ss:$8 sps:$4 sm:$0xff]  }
 0x26b   :  { %v450_v32 = vadd.f32 %v416_v10, %v400_v26  ;;  %v452_v56 = vadd.f32 %v424_v14, %v402_v27  ;;  %v449_v33 = vadd.f32 %v412_v15, %v399_v28  ;;  %v451_v58 = vadd.f32 %v420_v16, %v401_v29  ;;  %v2280_v10 = vld [vmem:[#allocation2 + $0x290] ss:$8 sps:$4 sm:$0xff]   ;;  %v2283_v12 = vld [vmem:[#allocation2 + $0x2a0] ss:$8 sps:$4 sm:$0xff]   ;;  %v2291_v14 = vld [vmem:[#allocation2 + $0x2c4] ss:$8 sps:$4 sm:$0xff]  }
 0x26c   :  { %v454_v34 = vadd.f32 %v432_v17, %v404_v30  ;;  %v2725_v52 = vadd.f32 %v428_v54, %v403_v57  ;;  %v2727_v60 = vadd.f32 %v440_v62, %v406_v31  ;;  %v2729_v53 = vadd.f32 %v436_v48, %v405_v59  ;;  %v2261_v54 = vld [vmem:[#allocation2 + $0x224] ss:$8 sps:$4 sm:$0xff]   ;;  %v2264_v62 = vld [vmem:[#allocation2 + $0x234] ss:$8 sps:$4 sm:$0xff]   ;;  %v2265_v48 = vld [vmem:[#allocation2 + $0x240] ss:$8 sps:$4 sm:$0xff]  }
 0x26d   :  { %v458_v1 = vmax.f32 %v450_v32, 0.0  ;;  %v460_v35 = vmax.f32 %v452_v56, 0.0  ;;  %v457_v36 = vmax.f32 %v449_v33, 0.0  ;;  %v459_v37 = vmax.f32 %v451_v58, 0.0  ;;  %v2289_v15 = vld [vmem:[#allocation2 + $0x2c0] ss:$8 sps:$4 sm:$0xff]  }
 0x26e   :  { %v462_v38 = vmax.f32 %v454_v34, 0.0  ;;  %v2294_v16 = vld [vmem:[#allocation2 + $0x2d4] ss:$8 sps:$4 sm:$0xff]   ;;  %v2292_v17 = vld [vmem:[#allocation2 + $0x2d0] ss:$8 sps:$4 sm:$0xff]   ;;  %v461_v22 = vmax.f32 %v2725_v52, 0.0 }
 0x26f   :  { %v466_v39 = vpack.c.bf16 %v458_v1, %v458_v1  ;;  %v468_v40 = vpack.c.bf16 %v460_v35, %v460_v35  ;;  %v465_v43 = vpack.c.bf16 %v457_v36, %v457_v36  ;;  %v467_v44 = vpack.c.bf16 %v459_v37, %v459_v37  ;;  %v2297_v18 = vld [vmem:[#allocation2 + $0x2e4] ss:$8 sps:$4 sm:$0xff]   ;;  %v2295_v19 = vld [vmem:[#allocation2 + $0x2e0] ss:$8 sps:$4 sm:$0xff]   ;;  %v2300_v20 = vld [vmem:[#allocation2 + $0x2f4] ss:$8 sps:$4 sm:$0xff]  }
 0x270   :  { %v470_v46 = vpack.c.bf16 %v462_v38, %v462_v38  ;;  %v2298_v21 = vld [vmem:[#allocation2 + $0x2f0] ss:$8 sps:$4 sm:$0xff]   ;;  %v2303_v23 = vld [vmem:[#allocation2 + $0x304] ss:$8 sps:$4 sm:$0xff]   ;;  %v464_v24 = vmax.f32 %v2727_v60, 0.0  ;;  %v469_v26 = vpack.c.bf16 %v461_v22, %v461_v22 }
 0x271   :  { %1285 = vmatprep.mubr.bf16.mxu1 %v466_v39  ;;  %1326 = vmatprep.mubr.bf16.mxu0 %v468_v40  ;;  %v2301_v25 = vld [vmem:[#allocation2 + $0x300] ss:$8 sps:$4 sm:$0xff]   ;;  %v2306_v27 = vld [vmem:[#allocation2 + $0x314] ss:$8 sps:$4 sm:$0xff]   ;;  %v2304_v29 = vld [vmem:[#allocation2 + $0x310] ss:$8 sps:$4 sm:$0xff]  }
 0x272   :  { %1286 = vmatmul.mubr.bf16.vlgmr.msra.gmra.mrb[4].mxu1 %v465_v43  ;;  %1327 = vmatmul.mubr.bf16.vlgmr.msra.gmra.mrb[0].mxu0 %v467_v44  ;;  %v472_v28 = vpack.c.bf16 %v464_v24, %v464_v24  ;;  %v2309_v30 = vld [vmem:[#allocation2 + $0x324] ss:$8 sps:$4 sm:$0xff]   ;;  %v2307_v57 = vld [vmem:[#allocation2 + $0x320] ss:$8 sps:$4 sm:$0xff]   ;;  %v2312_v31 = vld [vmem:[#allocation2 + $0x334] ss:$8 sps:$4 sm:$0xff]  }
 0x273   :  { %1336 = vmatpush1.bf16.msra.mxu0 %v2253_v42  ;;  %1367 = vmatprep.mubr.bf16.mxu0 %v470_v46  ;;  %v2310_v59 = vld [vmem:[#allocation2 + $0x330] ss:$8 sps:$4 sm:$0xff]   ;;  %v2315_v32 = vld [vmem:[#allocation2 + $0x344] ss:$8 sps:$4 sm:$0xff]   ;;  %v2313_v56 = vld [vmem:[#allocation2 + $0x340] ss:$8 sps:$4 sm:$0xff]  }
 0x274   :  { %1337 = vmatprep.subr.bf16.mxu0 %v2258_v45  ;;  %v2318_v33 = vld [vmem:[#allocation2 + $0x354] ss:$8 sps:$4 sm:$0xff]   ;;  %v2316_v58 = vld [vmem:[#allocation2 + $0x350] ss:$8 sps:$4 sm:$0xff]   ;;  %v2321_v34 = vld [vmem:[#allocation2 + $0x364] ss:$8 sps:$4 sm:$0xff]  }
 0x275   :  { %v2319_v52 = vld [vmem:[#allocation2 + $0x360] ss:$8 sps:$4 sm:$0xff]   ;;  %v2324_v60 = vld [vmem:[#allocation2 + $0x374] ss:$8 sps:$4 sm:$0xff]  }
 0x276   :  { %v1420_v1 = vld [vmem:[#allocation5 + $0x8] sm:$0xff]  ;;  %v1422_v35 = vld [vmem:[#allocation5 + $0x18] sm:$0xff]  ;;  %v1419_v36 = vld [vmem:[#allocation5] sm:$0xff] }
 0x277   :  { %1338 = vmatpush1.bf16.msra.mxu0 %v2256_v51  ;;  %v2034_v37 = vpack.c.bf16 %v1422_v35, %v1420_v1  ;;  %v1421_v38 = vld [vmem:[#allocation5 + $0x10] sm:$0xff]  ;;  %v1424_v39 = vld [vmem:[#allocation5 + $0x28] sm:$0xff]  ;;  %v1426_v40 = vld [vmem:[#allocation5 + $0x38] sm:$0xff] }
 0x278   :  { %1339 = vmatprep.subr.bf16.mxu0 %v2261_v54  ;;  %v2036_v42 = vpack.c.bf16 %v1421_v38, %v1419_v36  ;;  %v2038_v43 = vpack.c.bf16 %v1426_v40, %v1424_v39  ;;  %v1423_v44 = vld [vmem:[#allocation5 + $0x20] sm:$0xff]  ;;  %v1425_v45 = vld [vmem:[#allocation5 + $0x30] sm:$0xff]  ;;  %v1428_v46 = vld [vmem:[#allocation5 + $0x48] sm:$0xff] }
 0x279   :  { %v2322_v51 = vld [vmem:[#allocation2 + $0x370] ss:$8 sps:$4 sm:$0xff]   ;;  %2035 = vmatprep.subr.bf16.mxu1 %v2034_v37  ;;  %v1439_v22 = vld [vmem:[#allocation5 + $0xa0] sm:$0xff]  ;;  %v1444_v24 = vld [vmem:[#allocation5 + $0xc8] sm:$0xff] }
 0x27a   :  { %v1430_v54 = vld [vmem:[#allocation5 + $0x58] sm:$0xff]  ;;  %2037 = vmatpush1.bf16.msra.mxu1 %v2036_v42  ;;  %v2345_v36 = vld [vmem:[#allocation2 + $0x3e4] ss:$8 sps:$4 sm:$0xff]   ;;  %v1453_v40 = vld [vmem:[#allocation5 + $0x110] sm:$0xff] }
 0x27b   :  { %1340 = vmatpush1.bf16.msra.mxu0 %v2259_v61  ;;  %v2327_v61 = vld [vmem:[#allocation2 + $0x384] ss:$8 sps:$4 sm:$0xff]   ;;  %2039 = vmatprep.subr.bf16.mxu1 %v2038_v43  ;;  %v1454_v1 = vld [vmem:[#allocation5 + $0x118] sm:$0xff] }
 0x27c   :  { %1341 = vmatprep.subr.bf16.mxu0 %v2264_v62  ;;  %v2040_v62 = vpack.c.bf16 %v1425_v45, %v1423_v44  ;;  %v2340_v35 = vld [vmem:[#allocation2 + $0x3d0] ss:$8 sps:$4 sm:$0xff]   ;;  %v1451_v39 = vld [vmem:[#allocation5 + $0x100] sm:$0xff]  ;;  %v1456_v42 = vld [vmem:[#allocation5 + $0x128] sm:$0xff] }
 0x27d   :  { %v1458_v43 = vld [vmem:[#allocation5 + $0x138] sm:$0xff]  ;;  %v2343_v44 = vld [vmem:[#allocation2 + $0x3e0] ss:$8 sps:$4 sm:$0xff]  }
 0x27e   :  { %2041 = vmatpush1.bf16.msra.mxu1 %v2040_v62  ;;  %v2348_v45 = vld [vmem:[#allocation2 + $0x3f4] ss:$8 sps:$4 sm:$0xff]   ;;  %v1460_v62 = vld [vmem:[#allocation5 + $0x148] sm:$0xff] }
 0x27f   :  { %1342 = vmatpush1.bf16.msra.mxu0 %v2262_v47  ;;  %v2042_v47 = vpack.c.bf16 %v1430_v54, %v1428_v46  ;;  %v2068_v46 = vpack.c.bf16 %v1453_v40, %v1451_v39  ;;  %v1455_v54 = vld [vmem:[#allocation5 + $0x120] sm:$0xff] }
 0x280   :  { %1343 = vmatprep.subr.bf16.mxu0 %v2267_v41  ;;  %v1427_v41 = vld [vmem:[#allocation5 + $0x40] sm:$0xff] }
 0x281   :  { %2043 = vmatprep.subr.bf16.mxu1 %v2042_v47  ;;  %v1462_v47 = vld [vmem:[#allocation5 + $0x158] sm:$0xff] }
 0x283   :  { %1344 = vmatpush1.bf16.msra.mxu0 %v2265_v48  ;;  %v1429_v48 = vld [vmem:[#allocation5 + $0x50] sm:$0xff] }
 0x284   :  { %1345 = vmatprep.subr.bf16.mxu0 %v2270_v49  ;;  %v1432_v49 = vld [vmem:[#allocation5 + $0x68] sm:$0xff] }
 0x287   :  { %1346 = vmatpush1.bf16.msra.mxu0 %v2268_v63  ;;  %v1434_v63 = vld [vmem:[#allocation5 + $0x78] sm:$0xff] }
 0x288   :  { %1347 = vmatprep.subr.bf16.mxu0 %v2273_v2  ;;  %v2325_v2 = vld [vmem:[#allocation2 + $0x380] ss:$8 sps:$4 sm:$0xff]  }
 0x28b   :  { %1348 = vmatpush1.bf16.msra.mxu0 %v2271_v3  ;;  %v2330_v3 = vld [vmem:[#allocation2 + $0x394] ss:$8 sps:$4 sm:$0xff]  }
 0x28c   :  { %1349 = vmatprep.subr.bf16.mxu0 %v2276_v5  ;;  %v2044_v5 = vpack.c.bf16 %v1429_v48, %v1427_v41  ;;  %v2346_v41 = vld [vmem:[#allocation2 + $0x3f0] ss:$8 sps:$4 sm:$0xff]   ;;  %v463_v48 = vmax.f32 %v2729_v53, 0.0 }
 0x28e   :  { %2045 = vmatpush1.bf16.msra.mxu1 %v2044_v5  ;;  %v1464_v5 = vld [vmem:[#allocation5 + $0x168] sm:$0xff] }
 0x28f   :  { %1350 = vmatpush1.bf16.msra.mxu0 %v2274_v7  ;;  %v2046_v7 = vpack.c.bf16 %v1434_v63, %v1432_v49  ;;  %v2074_v63 = vpack.c.bf16 %v1462_v47, %v1460_v62 }
 0x290   :  { %1351 = vmatprep.subr.bf16.mxu0 %v2279_v8  ;;  %v1431_v8 = vld [vmem:[#allocation5 + $0x60] sm:$0xff] }
 0x291   :  { %2047 = vmatprep.subr.bf16.mxu1 %v2046_v7  ;;  %v1466_v7 = vld [vmem:[#allocation5 + $0x178] sm:$0xff] }
 0x293   :  { %1352 = vmatpush1.bf16.msra.mxu0 %v2277_v50  ;;  %v1433_v50 = vld [vmem:[#allocation5 + $0x70] sm:$0xff] }
 0x294   :  { %1353 = vmatprep.subr.bf16.mxu0 %v2282_v9  ;;  %v1436_v9 = vld [vmem:[#allocation5 + $0x88] sm:$0xff] }
 0x297   :  { %1354 = vmatpush1.bf16.msra.mxu0 %v2280_v10  ;;  %v1438_v10 = vld [vmem:[#allocation5 + $0x98] sm:$0xff] }
 0x298   :  { %1355 = vmatprep.subr.bf16.mxu0 %v2285_v11  ;;  %v2328_v11 = vld [vmem:[#allocation2 + $0x390] ss:$8 sps:$4 sm:$0xff]  }
 0x29b   :  { %1356 = vmatpush1.bf16.msra.mxu0 %v2283_v12  ;;  %v2333_v12 = vld [vmem:[#allocation2 + $0x3a4] ss:$8 sps:$4 sm:$0xff]  }
 0x29c   :  { %1357 = vmatprep.subr.bf16.mxu0 %v2288_v55  ;;  %v2048_v55 = vpack.c.bf16 %v1433_v50, %v1431_v8  ;;  %v471_v8 = vpack.c.bf16 %v463_v48, %v463_v48 }
 0x29e   :  { %2049 = vmatpush1.bf16.msra.mxu1 %v2048_v55  ;;  %v1470_v55 = vld [vmem:[#allocation5 + $0x198] sm:$0xff] }
 0x29f   :  { %1358 = vmatpush1.bf16.msra.mxu0 %v2286_v13  ;;  %v2050_v13 = vpack.c.bf16 %v1438_v10, %v1436_v9  ;;  %v2078_v9 = vpack.c.bf16 %v1466_v7, %v1464_v5  ;;  %v1463_v10 = vld [vmem:[#allocation5 + $0x160] sm:$0xff]  ;;  %v1589_v5 = vld [vmem:[%s2884_s8 + $0xa8] sm:$0xff] }
 0x2a0   :  { %1359 = vmatprep.subr.bf16.mxu0 %v2291_v14  ;;  %v1435_v14 = vld [vmem:[#allocation5 + $0x80] sm:$0xff] }
 0x2a1   :  { %2051 = vmatprep.subr.bf16.mxu1 %v2050_v13 }
 0x2a3   :  { %1360 = vmatpush1.bf16.msra.mxu0 %v2289_v15  ;;  %v1437_v15 = vld [vmem:[#allocation5 + $0x90] sm:$0xff] }
 0x2a4   :  { %1361 = vmatprep.subr.bf16.mxu0 %v2294_v16  ;;  %v1440_v16 = vld [vmem:[#allocation5 + $0xa8] sm:$0xff] }
 0x2a7   :  { %1362 = vmatpush1.bf16.msra.mxu0 %v2292_v17  ;;  %v1442_v17 = vld [vmem:[#allocation5 + $0xb8] sm:$0xff] }
 0x2a8   :  { %1363 = vmatprep.subr.bf16.mxu0 %v2297_v18  ;;  %v2331_v18 = vld [vmem:[#allocation2 + $0x3a0] ss:$8 sps:$4 sm:$0xff]  }
 0x2ab   :  { %1364 = vmatpush1.bf16.msra.mxu0 %v2295_v19  ;;  %v2336_v19 = vld [vmem:[#allocation2 + $0x3b4] ss:$8 sps:$4 sm:$0xff]  }
 0x2ac   :  { %1365 = vmatprep.subr.bf16.mxu0 %v2300_v20  ;;  %v2052_v20 = vpack.c.bf16 %v1437_v15, %v1435_v14  ;;  %v1467_v14 = vld [vmem:[#allocation5 + $0x180] sm:$0xff]  ;;  %v1469_v15 = vld [vmem:[#allocation5 + $0x190] sm:$0xff] }
 0x2ae   :  { %2053 = vmatpush1.bf16.msra.mxu1 %v2052_v20  ;;  %v1471_v20 = vld [vmem:[#allocation5 + $0x1a0] sm:$0xff] }
 0x2af   :  { %1366 = vmatpush1.bf16.msra.mxu0 %v2298_v21  ;;  %v2054_v21 = vpack.c.bf16 %v1442_v17, %v1440_v16  ;;  %v1472_v16 = vld [vmem:[#allocation5 + $0x1a8] sm:$0xff]  ;;  %v1474_v17 = vld [vmem:[#allocation5 + $0x1b8] sm:$0xff] }
 0x2b0   :  { %1376 = vmatprep.subr.bf16.mxu0 %v2303_v23  ;;  %v1441_v23 = vld [vmem:[#allocation5 + $0xb0] sm:$0xff] }
 0x2b1   :  { %2055 = vmatprep.subr.bf16.mxu1 %v2054_v21  ;;  %v1473_v21 = vld [vmem:[#allocation5 + $0x1b0] sm:$0xff] }
 0x2b2   :  { %1368 = vmatmul.mubr.bf16.vlgmr.msra.gmra.mrb[0].mxu0 %v469_v26  ;;  %v2334_v26 = vld [vmem:[#allocation2 + $0x3b0] ss:$8 sps:$4 sm:$0xff]  }
 0x2b3   :  { %1377 = vmatpush1.bf16.msra.mxu0 %v2301_v25  ;;  %1408 = vmatprep.mubr.bf16.mxu0 %v472_v28  ;;  %v1446_v25 = vld [vmem:[#allocation5 + $0xd8] sm:$0xff]  ;;  %v2056_v28 = vpack.c.bf16 %v1441_v23, %v1439_v22  ;;  %v1476_v22 = vld [vmem:[#allocation5 + $0x1c8] sm:$0xff] }
 0x2b4   :  { %1378 = vmatprep.subr.bf16.mxu0 %v2306_v27  ;;  %v2339_v27 = vld [vmem:[#allocation2 + $0x3c4] ss:$8 sps:$4 sm:$0xff]   ;;  %v1478_v23 = vld [vmem:[#allocation5 + $0x1d8] sm:$0xff] }
 0x2b5   :  { %2057 = vmatpush1.bf16.msra.mxu1 %v2056_v28 }
 0x2b7   :  { %1379 = vmatpush1.bf16.msra.mxu0 %v2304_v29  ;;  %v2058_v29 = vpack.c.bf16 %v1446_v25, %v1444_v24  ;;  %v2088_v24 = vpack.c.bf16 %v1473_v21, %v1471_v20  ;;  %v2090_v25 = vpack.c.bf16 %v1478_v23, %v1476_v22  ;;  %v1594_v20 = vld [vmem:[%s2884_s8 + $0xd0] sm:$0xff]  ;;  %v1595_v21 = vld [vmem:[%s2884_s8 + $0xd8] sm:$0xff] }
 0x2b8   :  { %1380 = vmatprep.subr.bf16.mxu0 %v2309_v30  ;;  %v1443_v30 = vld [vmem:[#allocation5 + $0xc0] sm:$0xff]  ;;  %v2118_v23 = vpack.c.bf16 %v1595_v21, %v1594_v20 }
 0x2b9   :  { %2059 = vmatprep.subr.bf16.mxu1 %v2058_v29 }
 0x2bb   :  { %1381 = vmatpush1.bf16.msra.mxu0 %v2307_v57  ;;  %v1445_v57 = vld [vmem:[#allocation5 + $0xd0] sm:$0xff] }
 0x2bc   :  { %1382 = vmatprep.subr.bf16.mxu0 %v2312_v31  ;;  %v1448_v31 = vld [vmem:[#allocation5 + $0xe8] sm:$0xff] }
 0x2bf   :  { %1383 = vmatpush1.bf16.msra.mxu0 %v2310_v59  ;;  %v1450_v59 = vld [vmem:[#allocation5 + $0xf8] sm:$0xff] }
 0x2c0   :  { %1384 = vmatprep.subr.bf16.mxu0 %v2315_v32  ;;  %v2337_v32 = vld [vmem:[#allocation2 + $0x3c0] ss:$8 sps:$4 sm:$0xff]  }
 0x2c3   :  { %1385 = vmatpush1.bf16.msra.mxu0 %v2313_v56  ;;  %v2342_v56 = vld [vmem:[#allocation2 + $0x3d4] ss:$8 sps:$4 sm:$0xff]  }
 0x2c4   :  { %1386 = vmatprep.subr.bf16.mxu0 %v2318_v33  ;;  %v2060_v33 = vpack.c.bf16 %v1445_v57, %v1443_v30  ;;  %v1480_v57 = vld [vmem:[#allocation5 + $0x1e8] sm:$0xff] }
 0x2c6   :  { %2061 = vmatpush1.bf16.msra.mxu1 %v2060_v33  ;;  %v1481_v33 = vld [vmem:[#allocation5 + $0x1f0] sm:$0xff] }
 0x2c7   :  { %1387 = vmatpush1.bf16.msra.mxu0 %v2316_v58  ;;  %v2062_v58 = vpack.c.bf16 %v1450_v59, %v1448_v31  ;;  %v1482_v31 = vld [vmem:[#allocation5 + $0x1f8] sm:$0xff] }
 0x2c8   :  { %1388 = vmatprep.subr.bf16.mxu0 %v2321_v34  ;;  %v1447_v34 = vld [vmem:[#allocation5 + $0xe0] sm:$0xff] }
 0x2c9   :  { %2063 = vmatprep.subr.bf16.mxu1 %v2062_v58 }
 0x2cb   :  { %1389 = vmatpush1.bf16.msra.mxu0 %v2319_v52  ;;  %v1449_v52 = vld [vmem:[#allocation5 + $0xf0] sm:$0xff] }
 0x2cc   :  { %1390 = vmatprep.subr.bf16.mxu0 %v2324_v60  ;;  %v1452_v60 = vld [vmem:[#allocation5 + $0x108] sm:$0xff]  ;;  %v2064_v37 = vpack.c.bf16 %v1449_v52, %v1447_v34  ;;  %v1584_v52 = vld [vmem:[%s2884_s8 + $0x80] sm:$0xff] }
 0x2cd   :  { %v2066_v38 = vpack.c.bf16 %v1454_v1, %v1452_v60  ;;  %v1585_v60 = vld [vmem:[%s2884_s8 + $0x88] sm:$0xff] }
 0x2ce   :  { %2065 = vmatpush1.bf16.msra.mxu1 %v2064_v37  ;;  %v2098_v1 = vpack.c.bf16 %v1585_v60, %v1584_v52  ;;  %v1483_v52 = vld [vmem:[%s2883_s7] sm:$0x3]  ;;  %s2454_s7 = smov 116  }
 0x2cf   :  { %1391 = vmatpush1.bf16.msra.mxu0 %v2322_v51  ;;  %2067 = vmatprep.subr.bf16.mxu1 %v2066_v38  ;;  %v2070_v51 = vpack.c.bf16 %v1458_v43, %v1456_v42  ;;  %v1488_v60 = vrot.slane %v1483_v52, %v2711_v6 }
 0x2d0   :  { %1392 = vmatprep.subr.bf16.mxu0 %v2327_v61  ;;  %v1457_v61 = vld [vmem:[#allocation5 + $0x130] sm:$0xff] }
 0x2d1   :  { %v2072_v49 = vpack.c.bf16 %v1457_v61, %v1455_v54  ;;  %v1586_v54 = vld [vmem:[%s2884_s8 + $0x90] sm:$0xff]  ;;  %v1587_v61 = vld [vmem:[%s2884_s8 + $0x98] sm:$0xff] }
 0x2d2   :  { %2069 = vmatpush1.bf16.msra.mxu1 %v2068_v46 }
 0x2d3   :  { %1393 = vmatpush1.bf16.msra.mxu0 %v2325_v2  ;;  %2071 = vmatprep.subr.bf16.mxu1 %v2070_v51  ;;  %v1459_v2 = vld [vmem:[#allocation5 + $0x140] sm:$0xff] }
 0x2d4   :  { %1394 = vmatprep.subr.bf16.mxu0 %v2330_v3  ;;  %v1461_v3 = vld [vmem:[#allocation5 + $0x150] sm:$0xff] }
 0x2d5   :  { %v2076_v50 = vpack.c.bf16 %v1461_v3, %v1459_v2  ;;  %v1571_v2 = vld [vmem:[%s2884_s8 + $0x18] sm:$0xff]  ;;  %v1588_v3 = vld [vmem:[%s2884_s8 + $0xa0] sm:$0xff] }
 0x2d6   :  { %2073 = vmatpush1.bf16.msra.mxu1 %v2072_v49  ;;  %v2102_v49 = vpack.c.bf16 %v1587_v61, %v1586_v54 }
 0x2d7   :  { %1395 = vmatpush1.bf16.msra.mxu0 %v2328_v11  ;;  %2075 = vmatprep.subr.bf16.mxu1 %v2074_v63  ;;  %v1465_v11 = vld [vmem:[#allocation5 + $0x170] sm:$0xff] }
 0x2d8   :  { %1396 = vmatprep.subr.bf16.mxu0 %v2333_v12  ;;  %v1468_v12 = vld [vmem:[#allocation5 + $0x188] sm:$0xff]  ;;  %v2080_v53 = vpack.c.bf16 %v1465_v11, %v1463_v10  ;;  %v1570_v63 = vld [vmem:[%s2884_s8 + $0x10] sm:$0xff]  ;;  %v1591_v11 = vld [vmem:[%s2884_s8 + $0xb8] sm:$0xff] }
 0x2d9   :  { %v2082_v13 = vpack.c.bf16 %v1470_v55, %v1468_v12  ;;  %v2104_v7 = vpack.c.bf16 %v1571_v2, %v1570_v63  ;;  %v1590_v10 = vld [vmem:[%s2884_s8 + $0xb0] sm:$0xff] }
 0x2da   :  { %2077 = vmatpush1.bf16.msra.mxu1 %v2076_v50  ;;  %v1572_v50 = vld [vmem:[%s2884_s8 + $0x20] sm:$0xff]  ;;  %v2110_v55 = vpack.c.bf16 %v1591_v11, %v1590_v10 }
 0x2db   :  { %1397 = vmatpush1.bf16.msra.mxu0 %v2331_v18  ;;  %2079 = vmatprep.subr.bf16.mxu1 %v2078_v9  ;;  %v2084_v18 = vpack.c.bf16 %v1469_v15, %v1467_v14  ;;  %v1573_v9 = vld [vmem:[%s2884_s8 + $0x28] sm:$0xff]  ;;  %v1592_v14 = vld [vmem:[%s2884_s8 + $0xc0] sm:$0xff] }
 0x2dc   :  { %1398 = vmatprep.subr.bf16.mxu0 %v2336_v19  ;;  %v2086_v19 = vpack.c.bf16 %v1474_v17, %v1472_v16  ;;  %v2108_v12 = vpack.c.bf16 %v1573_v9, %v1572_v50  ;;  %v1593_v15 = vld [vmem:[%s2884_s8 + $0xc8] sm:$0xff] }
 0x2dd   :  { %v2114_v17 = vpack.c.bf16 %v1593_v15, %v1592_v14 }
 0x2de   :  { %2081 = vmatpush1.bf16.msra.mxu1 %v2080_v53  ;;  %v1574_v53 = vld [vmem:[%s2884_s8 + $0x30] sm:$0xff] }
 0x2df   :  { %1399 = vmatpush1.bf16.msra.mxu0 %v2334_v26  ;;  %2083 = vmatprep.subr.bf16.mxu1 %v2082_v13  ;;  %v1475_v26 = vld [vmem:[#allocation5 + $0x1c0] sm:$0xff]  ;;  %v1575_v13 = vld [vmem:[%s2884_s8 + $0x38] sm:$0xff] }
 0x2e0   :  { %1400 = vmatprep.subr.bf16.mxu0 %v2339_v27  ;;  %v1477_v27 = vld [vmem:[#allocation5 + $0x1d0] sm:$0xff]  ;;  %v2112_v16 = vpack.c.bf16 %v1575_v13, %v1574_v53 }
 0x2e1   :  { %v2092_v28 = vpack.c.bf16 %v1477_v27, %v1475_v26  ;;  %v1596_v26 = vld [vmem:[%s2884_s8 + $0xe0] sm:$0xff]  ;;  %v1597_v27 = vld [vmem:[%s2884_s8 + $0xe8] sm:$0xff] }
 0x2e2   :  { %2085 = vmatpush1.bf16.msra.mxu1 %v2084_v18  ;;  %v1576_v18 = vld [vmem:[%s2884_s8 + $0x40] sm:$0xff] }
 0x2e3   :  { %1401 = vmatpush1.bf16.msra.mxu0 %v2337_v32  ;;  %2087 = vmatprep.subr.bf16.mxu1 %v2086_v19  ;;  %v2094_v32 = vpack.c.bf16 %v1482_v31, %v1480_v57  ;;  %v1577_v19 = vld [vmem:[%s2884_s8 + $0x48] sm:$0xff] }
 0x2e4   :  { %1402 = vmatprep.subr.bf16.mxu0 %v2342_v56  ;;  %v1479_v56 = vld [vmem:[#allocation5 + $0x1e0] sm:$0xff]  ;;  %v2116_v22 = vpack.c.bf16 %v1577_v19, %v1576_v18  ;;  %v1581_v57 = vld [vmem:[%s2884_s8 + $0x68] sm:$0xff] }
 0x2e5   :  { %v2096_v34 = vpack.c.bf16 %v1481_v33, %v1479_v56  ;;  %v1582_v33 = vld [vmem:[%s2884_s8 + $0x70] sm:$0xff] }
 0x2e6   :  { %2089 = vmatpush1.bf16.msra.mxu1 %v2088_v24  ;;  %v1578_v24 = vld [vmem:[%s2884_s8 + $0x50] sm:$0xff] }
 0x2e7   :  { %1403 = vmatpush1.bf16.msra.mxu0 %v2340_v35  ;;  %2091 = vmatprep.subr.bf16.mxu1 %v2090_v25  ;;  %v601_v35 = vld [vmem:[%s2881_s5] sm:$0x3]  ;;  %v1579_v25 = vld [vmem:[%s2884_s8 + $0x58] sm:$0xff] }
 0x2e8   :  { %1404 = vmatprep.subr.bf16.mxu0 %v2345_v36  ;;  %v606_v36 = vrot.slane %v601_v35, %v2711_v6  ;;  %v610_v37 = vrot.slane %v601_v35, %v2709_v4 }
 0x2ea   :  { %2093 = vmatpush1.bf16.msra.mxu1 %v2092_v28  ;;  %v2120_v28 = vpack.c.bf16 %v1579_v25, %v1578_v24 }
 0x2eb   :  { %1405 = vmatpush1.bf16.msra.mxu0 %v2343_v44  ;;  %2095 = vmatprep.subr.bf16.mxu1 %v2094_v32  ;;  %v1568_v44 = vld [vmem:[%s2884_s8] sm:$0xff]  ;;  %v1599_v32 = vld [vmem:[%s2884_s8 + $0xf8] sm:$0xff] }
 0x2ec   :  { %1406 = vmatprep.subr.bf16.mxu0 %v2348_v45  ;;  %v1569_v45 = vld [vmem:[%s2884_s8 + $0x8] sm:$0xff] }
 0x2ee   :  { %2097 = vmatpush1.bf16.msra.mxu1 %v2096_v34 }
 0x2ef   :  { %1407 = vmatpush1.bf16.msra.mxu0 %v2346_v41  ;;  %2099 = vmatprep.subr.bf16.mxu1 %v2098_v1  ;;  %v2100_v41 = vpack.c.bf16 %v1569_v45, %v1568_v44  ;;  %v1492_v1 = vrot.slane %v1483_v52, %v2709_v4 }
 0x2f2   :  { %1409 = vmatmul.mubr.bf16.vlgmr.msra.gmra.mrb[0].mxu0 %v471_v8  ;;  %v2106_v8 = vpack.c.bf16 %v1589_v5, %v1588_v3 }
 0x345   :  { %v1287_v29 = vpop.f32.mrb[4].mxu1 }
 0x346   :  { %v1289_v30 = vpop.f32.mrb[5].mxu1  ;;  %v1288_v38 = vadd.f32 %v1287_v29, %v606_v36  ;;  %v2122_v29 = vpack.c.bf16 %v1597_v27, %v1596_v26 }
 0x347   :  { %v1291_v59 = vpop.f32.mrb[6].mxu1  ;;  %v1290_v39 = vadd.f32 %v1289_v30, %v610_v37  ;;  %v1580_v30 = vld [vmem:[%s2884_s8 + $0x60] sm:$0xff] }
 0x348   :  { %v1292_v58 = vpop.f32.mrb[7].mxu1  ;;  %v2124_v31 = vpack.c.bf16 %v1581_v57, %v1580_v30  ;;  %v1598_v59 = vld [vmem:[%s2884_s8 + $0xf0] sm:$0xff] }
 0x349   :  { %v2126_v56 = vpack.c.bf16 %v1599_v32, %v1598_v59  ;;  %v1583_v58 = vld [vmem:[%s2884_s8 + $0x78] sm:$0xff] }
 0x34a   :  { %v2128_v34 = vpack.c.bf16 %v1583_v58, %v1582_v33 }
 0x3c5   :  { %v1410_v40 = vpop.f32.mrb[0].mxu0 }
 0x3c6   :  { %v2131_v42 = vadd.f32 %v1410_v40, %v1288_v38  ;;  %v1412_v43 = vpop.f32.mrb[1].mxu0 }
 0x3c7   :  { %v2133_v46 = vadd.f32 %v1412_v43, %v1290_v39  ;;  %v1414_v51 = vpop.f32.mrb[2].mxu0  ;;  %v1973_v43 = vld [vmem:[%s2885_s9] ss:$0 sm:$0xff]  ;;  %s2458_s9 = smov [#allocation7]  }
 0x3c8   :  { %v1415_v62 = vpop.f32.mrb[3].mxu0  ;;  %v1417_v48 = vmax.f32 %v2131_v42, 0.0  ;;  %s1807_s4 = sshll.u32 %s2458_s9, 4  ;;  %s1808_s4 = int_to_ptr.vmem [resolvable:$true] %s1807_s4 }
 0x3c9   :  { %v1418_v47 = vmax.f32 %v2133_v46, 0.0  ;;  %s2395_s18 = scalar_lea.vmem %s1808_s4, 32  ;;  %p2400_p3 = scmp.lt.s32.totalorder %s1808_s4, %s1808_s4 }
 0x3ca   :  { %p2396_p2 = scmp.ne.s32.totalorder %s1808_s4, %s2395_s18  ;;  %p2401_p4 = scmp.lt.s32.totalorder %s2395_s18, %s2395_s18 }
 0x3cb   :  { %1559 = vmatprep.mubr.f32.mxu1 %v1418_v47 }
 0x3cc   :  { %1560 = vmatmul.mubr.f32.vlgmr.msra.gmra.mrb[8].mxu1 %v1417_v48  ;;  %p2402_p5 = por %p2401_p4, %p2400_p3 }
 0x3cd   :  { %2101 = vmatpush3.bf16.msra.mxu1 %v2100_v41 }
 0x3ce   :  { %2103 = vmatprep.subr.bf16.mxu1 %v2102_v49  ;;  %p2403_p6 = pnand %p2402_p5, %p2396_p2 }
 0x3d1   :  { %2105 = vmatpush3.bf16.msra.mxu1 %v2104_v7 }
 0x3d2   :  { %2107 = vmatprep.subr.bf16.mxu1 %v2106_v8 }
 0x3d5   :  { %2109 = vmatpush3.bf16.msra.mxu1 %v2108_v12 }
 0x3d6   :  { %2111 = vmatprep.subr.bf16.mxu1 %v2110_v55 }
 0x3d9   :  { %2113 = vmatpush3.bf16.msra.mxu1 %v2112_v16 }
 0x3da   :  { %2115 = vmatprep.subr.bf16.mxu1 %v2114_v17 }
 0x3dd   :  { %2117 = vmatpush3.bf16.msra.mxu1 %v2116_v22 }
 0x3de   :  { %2119 = vmatprep.subr.bf16.mxu1 %v2118_v23 }
 0x3e1   :  { %2121 = vmatpush3.bf16.msra.mxu1 %v2120_v28 }
 0x3e2   :  { %2123 = vmatprep.subr.bf16.mxu1 %v2122_v29 }
 0x3e5   :  { %2125 = vmatpush3.bf16.msra.mxu1 %v2124_v31 }
 0x3e6   :  { %2127 = vmatprep.subr.bf16.mxu1 %v2126_v56 }
 0x3e9   :  { %2129 = vmatpush3.bf16.msra.mxu1 %v2128_v34 }
 0x3ea   :  { %2013 = vmatprep.subr.mxu1 %v2453_v0 }
 0x49f   :  { %v1561_v35 = vpop.f32.mrb[8].mxu1 }
 0x4a0   :  { %v1562_v36 = vadd.f32 %v1561_v35, %v1488_v60  ;;  %v1563_v37 = vpop.f32.mrb[9].mxu1 }
 0x4a1   :  { %v1564_v38 = vadd.f32 %v1563_v37, %v1492_v1 }
 0x4a2   :  { %v1566_v40 = vmax.f32 %v1562_v36, 0.0 }
 0x4a3   :  { %v1567_v39 = vmax.f32 %v1564_v38, 0.0 }
 0x4a5   :  { %1671 = vmatprep.mubr.f32.mxu1 %v1567_v39 }
 0x4a6   :  { %1672 = vmatmul.mubr.f32.vlgmr.msra.gmra.mrb[10].mxu1 %v1566_v40 }
 0x4a7   :  { %2015 = vmatprep.mubr.msk.f32.mxu1 %vm2457_vm6, %v2453_v0 }
 0x579   :  { %v2008_v42 = vpop.f32.mrb[10].mxu1 }
 0x57a   :  { %v2009_v44 = vpop.f32.mrb[11].mxu1 }
 0x57b   :  { %v2010_v45 = vadd.f32 %v2009_v44, %v2008_v42 }
 0x57d   :  { %v1674_v46 = vadd.f32 %v2010_v45, %v1973_v43 }
 0x57f   :  { %v1688_v6 = vrot.slane %v1674_v46, 5  ;;  %v1680_v51 = vrot.slane %v1674_v46, 7  ;;  %1678 = vst.msk [vmem:[#allocation7] sm:$0x3] %vm1677_vm4, %v1674_v46  ;;  %v1684_v4 = vrot.slane %v1674_v46, 6  ;;  %v1693_v54 = vrot.slane %v1674_v46, 4 }
 0x580   :  { %v1697_v61 = vrot.slane %v1674_v46, 3  ;;  %v1701_v62 = vrot.slane %v1674_v46, 2 }
 0x581   :  { %1689 = vrot.lane.b32.xlu0 %v1688_v6, %s2454_s7  ;;  %1681 = vrot.lane.b32.xlu1 %v1680_v51, %s2455_s22 }
 0x585   :  { %1685 = vrot.lane.b32.xlu1 %v1684_v4, %s2456_s1 }
 0x589   :  { %1694 = vrot.lane.b32.xlu1 %v1693_v54, %s2455_s22 }
 0x58d   :  { %1698 = vrot.lane.b32.xlu1 %v1697_v61, %s2456_s1 }
 0x591   :  { %1702 = vrot.lane.b32.xlu1 %v1701_v62, %s2454_s7 }
 0x5f3   :  { %v1682_v47 = vpop.permute.xlu1 %1681  ;;  %v1690_v63 = vpop.permute.xlu0 %1689 }
 0x5f4   :  { %v1705_v48 = vsel %vm285_vm2, %v1674_v46, %v1682_v47 }
 0x5f7   :  { %v1686_v41 = vpop.permute.xlu1 %1685 }
 0x5f8   :  { %v1706_v49 = vsel %vm294_vm3, %v1705_v48, %v1686_v41 }
 0x5f9   :  { %v1708_v3 = vsel %vm1707_vm5, %v1706_v49, %v1690_v63 }
 0x5fa   :  { %v1709_v5 = vsel %vm92_vm0, %v1708_v3, %v1688_v6 }
 0x5fb   :  { %v1695_v2 = vpop.permute.xlu1 %1694 }
 0x5fc   :  { %v1711_v8 = vsel %vm1710_vm7, %v1709_v5, %v1695_v2 }
 0x5ff   :  { %v1699_v7 = vpop.permute.xlu1 %1698 }
 0x600   :  { %v1713_v50 = vsel %vm1712_vm8, %v1711_v8, %v1699_v7 }
 0x603   :  { %v1703_v9 = vpop.permute.xlu1 %1702 }
 0x604   :  { %v1715_v10 = vsel %vm1714_vm9, %v1713_v50, %v1703_v9 }
 0x605   :  { %1717 = vrot.lane.b32.xlu1 %v1715_v10, %s2455_s22 }
 0x677   :  { %v1718_v11 = vpop.permute.xlu1 %1717 }
 0x678   :  { %2014 = vmatpush3.xpose.msk.msra.mxu1 %vm1719_vm10, %v1718_v11 }
 0x67b   :  { %2016 = vmatmul.mubr.msk.f32.vlgmr.msra.gmra.mrb[12].mxu1 %vm1719_vm10, %v1718_v11 }
 0x67c   :  { %2406 = shalt.err (!%p2403_p6)
}
 0x67d   :  { %s2407_s24 = scalar_lea.hbm %s2886_s10, 32 }
 0x67e   :  { %p2408_p7 = scmp.ne.s32.totalorder %s2886_s10, %s2407_s24  ;;  %p2411_p8 = scmp.lt.u32.totalorder %s2407_s24, %s2886_s10 }
 0x680   :  { %p2413_p9 = pnand %p2411_p8, %p2408_p7 }
 0x682   :  { %2416 = shalt.err (!%p2413_p9)
}
 0x683   :  { %1810 = dma.vmem_to_hbm [thread:$0]  %s1808_s4, 32, %s2886_s10, [#allocation4]   ;;  %vm1792_vm11 = vcmask 27648   ;;  %vm1799_vm12 = vcmask 31748  }
 0x684   :  { %s2459_s29 = smov [#allocation8]  }
 0x685   :  { %s1816_s30 = sshll.u32 %s2459_s29, 4  ;;  %s1817_s30 = int_to_ptr.vmem [resolvable:$true] %s1816_s30 }
 0x686   :  { %s2417_s6 = scalar_lea.vmem %s1817_s30, 128  ;;  %p2422_p11 = scmp.lt.s32.totalorder %s1817_s30, %s1817_s30 }
 0x687   :  { %p2418_p10 = scmp.ne.s32.totalorder %s1817_s30, %s2417_s6  ;;  %p2423_p12 = scmp.lt.s32.totalorder %s2417_s6, %s2417_s6 }
 0x689   :  { %p2424_p13 = por %p2423_p12, %p2422_p11 }
 0x68b   :  { %p2425_p0 = pnand %p2424_p13, %p2418_p10 }
 0x74e   :  { %v1788_v0 = vpop.f32.mrb[12].mxu1 }
 0x74f   :  { %1793 = vst.msk [vmem:[#allocation8] sm:$0xf] %vm1792_vm11, %v1788_v0  ;;  %1795 = vrot.lane.b32.xlu1 %v1788_v0, %s2455_s22  ;;  %v2017_v12 = vpop.f32.mrb[13].mxu1 }
 0x7c1   :  { %v1796_v55 = vpop.permute.xlu1 %1795 }
 0x7c2   :  { %1800 = vst.msk [vmem:[#allocation8] sm:$0xf0] %vm1799_vm12, %v1796_v55 }
 0x7c3   :  { %2428 = shalt.err (!%p2425_p0)
}
 0x7c4   :  { %s2429_s13 = scalar_lea.hbm %s2887_s11, 128 }
 0x7c5   :  { %p2430_p1 = scmp.ne.s32.totalorder %s2887_s11, %s2429_s13  ;;  %p2433_p2 = scmp.lt.u32.totalorder %s2429_s13, %s2887_s11 }
 0x7c7   :  { %p2435_p3 = pnand %p2433_p2, %p2430_p1 }
 0x7c9   :  { %2438 = shalt.err (!%p2435_p3)
}
 0x7ca   :  { %s2460_s17 = smov 64   ;;  %s2461_s19 = smov 4  }
 0x7cb   :  { %1822 = dma.vmem_to_hbm [thread:$0]  %s1817_s30, 128, %s2887_s11, [#allocation9], %s2460_s17, %s2460_s17, %s2461_s19  }
 0x7cc   :  { %2443 = dma.done.wait [#allocation4], 32  }
 0x7cd   :  { %2444 = vsyncadd [#allocation4], 4294967264 }
 0x7ce   :  { %2445 = dma.done.wait [#allocation9], 128  }
 0x7cf   :  { %2446 = vsyncadd [#allocation9], 4294967168 }
 0x7d0   :  { %1829 = vsyncpa [#allocation3], 1 }
 0x7d1   :  { %1830 = vsyncpa [#allocation6], 1 }
 0x7d2   :  { %1831 = vsyncpa [#allocation4], 1 }
 0x7d3   :  { %1832 = vsyncpa [#allocation9], 1 }

</bundles_post_ra>
